<compile_context>
chip_gen: v7x
topology: tpu7x:2x2x1
jax: 0.10.0
libtpu: 0.0.40
codegen_flags: <defaults>
</compile_context>

<pallas_src>
import functools

import jax
import jax.numpy as jnp
from jax.experimental import pallas as pl
from jax.experimental.pallas import tpu as pltpu


# --------------------------------------------------------------------------- kernel

def _make_kernel(*, T, H, heads, q_num, levels, bias_slots, compute_dtype):
    """Fused BasicsBlock forward for ONE batch block of T rows."""
    dk = H // heads
    mid = q_num // 2

    def kernel(*refs):
        o_scr = refs[-1]          # (T, H) f32 VMEM scratch: attention head outputs
        out_ref = refs[-2]        # (Q, T) lane-dense output block for this batch
        it = iter(refs[:-2])

        x_ref = next(it)          # (T, C0)  this batch's inputs (time on sublanes)
        c_ref = next(it)          # (1, H)   this batch's static embedding
        bias_ref = next(it)       # (NB, BW) packed biases / LN vectors (f32)

        bias_all = bias_ref[...]

        def bias(name):
            r, w = bias_slots[name]
            return bias_all[r:r + 1, :w]            # (1, w) static slice of loaded value

        def mm(a, w_ref):                            # activation @ weight-ref
            return jnp.dot(a.astype(compute_dtype), w_ref[...].astype(compute_dtype),
                           preferred_element_type=jnp.float32)

        def dot_t(a, b):                             # (M,K) x (N,K) -> (M,N)
            return jax.lax.dot_general(a.astype(compute_dtype), b.astype(compute_dtype),
                                       (((1,), (1,)), ((), ())),
                                       preferred_element_type=jnp.float32)

        x = x_ref[...].astype(jnp.float32)

        # ----------------- TCN: causal dilated conv, kernel_size = 2 -----------------
        def causal_shift(v, d):
            # v[t-d] with zeros for t < d: XLU sublane rotate + iota mask (no copies).
            rolled = pltpu.roll(v, shift=d, axis=0)
            t = jax.lax.broadcasted_iota(jnp.int32, v.shape, 0)
            return jnp.where(t < d, 0.0, rolled)

        for i, lvl in enumerate(levels):
            d = lvl["dilation"]
            w1a, w1b = next(it), next(it)
            w2a, w2b = next(it), next(it)
            h1 = mm(causal_shift(x, d), w1a) + mm(x, w1b) + bias(f"tcn{i}_b1")
            h1 = jnp.maximum(h1, 0.0)
            h2 = mm(causal_shift(h1, d), w2a) + mm(h1, w2b) + bias(f"tcn{i}_b2")
            h2 = jnp.maximum(h2, 0.0)
            if lvl["down"]:
                res = mm(x, next(it)) + bias(f"tcn{i}_bd")
            else:
                res = x
            x = jnp.maximum(h2 + res, 0.0)            # (T, C_out)

        # ----------------- GRN (static-context gated residual network) ----------------
        w1s, wc, w2g = next(it), next(it), next(it)
        c_row = c_ref[...].astype(jnp.float32)        # (1, H)
        xw = mm(x, w1s)                               # (T, 2H): [x@W1 | x@Wskip]
        ctx = mm(c_row, wc) + bias("grn_b1")          # (1, H), once per batch block
        a = xw[:, :H] + ctx
        a = jnp.where(a > 0, a, jnp.exp(a) - 1.0)     # ELU
        gh = mm(a, w2g) + bias("grn_bg")              # (T, 2H): folded (W2 @ Wg)
        glu = gh[:, :H] * jax.nn.sigmoid(gh[:, H:])   # torch.nn.GLU convention
        z = xw[:, H:] + bias("grn_bs") + glu
        mu = jnp.mean(z, axis=-1, keepdims=True)
        var = jnp.mean(jnp.square(z - mu), axis=-1, keepdims=True)
        z = (z - mu) * jax.lax.rsqrt(var + 1e-5) * bias("grn_ln_g") + bias("grn_ln_b")

        # ----------------- multi-head self-attention ----------------------------------
        in_w = next(it)
        qkv = mm(z, in_w) + bias("attn_in_b")         # (T, 3H); Q cols pre-scaled 1/sqrt(dk)
        for hh in range(heads):
            c0 = hh * dk
            qh = qkv[:, c0:c0 + dk]
            kh = qkv[:, H + c0:H + c0 + dk]
            vh = qkv[:, 2 * H + c0:2 * H + c0 + dk]
            s = dot_t(qh, kh)                         # (T, T)
            m = jnp.max(s, axis=-1, keepdims=True)
            p = jnp.exp(s - m)
            p = p / jnp.sum(p, axis=-1, keepdims=True)
            # write in out_proj-input layout: no concatenation of head outputs
            o_scr[:, c0:c0 + dk] = jnp.dot(p.astype(compute_dtype),
                                           vh.astype(compute_dtype),
                                           preferred_element_type=jnp.float32)
        o = o_scr[...]                                # (T, H)

        # -------- fused out_proj @ quantile head, stored (Q, T) lane-dense ------------
        head_wT, head_b = next(it), next(it)          # (Q, H), (Q, 1)
        yT = dot_t(head_wT[...], o) + head_b[...]     # (Q, T): no in-kernel transpose
        row = jax.lax.broadcasted_iota(jnp.int32, yT.shape, 0)
        ay = jnp.abs(yT)
        out_ref[...] = jnp.where(row < mid, -ay, jnp.where(row == mid, yT, ay))

    return kernel


# --------------------------------------------------------------------------- param prep

def _pack_params(params, num_heads, *, compute_dtype=jnp.float32):
    """Repack PyTorch-layout weights into kernel layout (tiny one-time JAX ops)."""
    hi = jax.lax.Precision.HIGHEST
    H = params["grn"]["w1"].shape[1]
    dk = H // num_heads
    scale = 1.0 / float(dk) ** 0.5

    weights, bvecs, levels = [], [], []

    def add_w(w):
        weights.append(jnp.asarray(w, compute_dtype))

    def add_b(name, v):
        bvecs.append((name, jnp.asarray(v, jnp.float32).reshape(-1)))

    for i, lvl in enumerate(params["tcn"]):
        w1, w2 = lvl["w1"], lvl["w2"]                 # (C_out, C_in, 2)
        add_w(w1[:, :, 0].T); add_w(w1[:, :, 1].T)    # tap0 -> x[t-d], tap1 -> x[t]
        add_w(w2[:, :, 0].T); add_w(w2[:, :, 1].T)
        down = "wd" in lvl
        if down:
            add_w(lvl["wd"][:, :, 0].T)
        add_b(f"tcn{i}_b1", lvl["b1"]); add_b(f"tcn{i}_b2", lvl["b2"])
        if down:
            add_b(f"tcn{i}_bd", lvl["bd"])
        levels.append({"dilation": 2 ** i, "down": down})

    g = params["grn"]
    add_w(jnp.concatenate([g["w1"], g["ws"]], axis=1))              # [W1 | Wskip] (D, 2H)
    add_w(g["wc"])
    add_w(jnp.matmul(g["w2"], g["wg"], precision=hi))               # folded W2@Wg (H, 2H)
    add_b("grn_b1", g["b1"]); add_b("grn_bs", g["bs"])
    add_b("grn_bg", jnp.matmul(g["b2"], g["wg"], precision=hi) + g["bg"])
    add_b("grn_ln_g", g["ln_g"]); add_b("grn_ln_b", g["ln_b"])

    a, hd = params["attn"], params["head"]
    add_w(jnp.concatenate([a["in_w"][:, :H] * scale, a["in_w"][:, H:]], axis=1))
    add_b("attn_in_b", jnp.concatenate([a["in_b"][:H] * scale, a["in_b"][H:]]))
    w_f = jnp.matmul(a["out_w"], hd["w"], precision=hi)             # folded out_w@head (H, Q)
    b_f = jnp.matmul(a["out_b"], hd["w"], precision=hi) + hd["b"]   # (Q,)
    add_w(w_f.T)                                                    # (Q, H), transposed head
    weights.append(jnp.asarray(b_f, jnp.float32).reshape(-1, 1))    # (Q, 1) bias, kept f32

    # Pack all small bias / LN vectors into ONE lane-aligned array (single DMA).
    maxw = max(v.shape[0] for _, v in bvecs)
    bw = ((maxw + 127) // 128) * 128
    bias_slots, rows = {}, []
    for r, (name, v) in enumerate(bvecs):
        bias_slots[name] = (r, v.shape[0])
        rows.append(jnp.pad(v, (0, bw - v.shape[0])))
    bias_pack = jnp.stack(rows, axis=0)                             # (NB, bw) f32

    return weights, bias_pack, bias_slots, levels


# --------------------------------------------------------------------------- forward

def basics_block_forward(source_data, static_embedding, params, *, num_heads,
                         quantiles_num, compute_dtype=jnp.float32):
    """feature_future=None branch of BasicsBlock.forward (quantile output).

    source_data: (B, C_in, T) NCW, static_embedding: (B, H) -> (B, Q, T).
    compute_dtype=jnp.bfloat16 is recommended for the MXU operands on v6e/v7x.
    """
    B, C0, T = source_data.shape
    H = static_embedding.shape[-1]

    x = jnp.transpose(source_data, (0, 2, 1))                 # (B, T, C0), time on sublanes
    c = static_embedding.reshape(B, 1, H)                     # (B, 1, H)
    weights, bias_pack, bias_slots, levels = _pack_params(
        params, num_heads, compute_dtype=compute_dtype)

    kernel = _make_kernel(T=T, H=H, heads=num_heads, q_num=quantiles_num,
                          levels=levels, bias_slots=bias_slots,
                          compute_dtype=compute_dtype)

    def full_spec(arr):
        n = arr.ndim
        return pl.BlockSpec(arr.shape, lambda b: (0,) * n)    # same block every step -> DMA'd once

    in_specs = ([pl.BlockSpec((None, T, C0), lambda b: (b, 0, 0)),
                 pl.BlockSpec((None, 1, H), lambda b: (b, 0, 0)),
                 full_spec(bias_pack)]
                + [full_spec(w) for w in weights])

    return pl.pallas_call(
        kernel,
        grid=(B,),
        out_shape=jax.ShapeDtypeStruct((B, quantiles_num, T), jnp.float32),
        in_specs=in_specs,
        out_specs=pl.BlockSpec((None, quantiles_num, T), lambda b: (b, 0, 0)),
        scratch_shapes=[pltpu.VMEM((T, H), jnp.float32)],
        compiler_params=pltpu.CompilerParams(
            dimension_semantics=("parallel",),                # megacore: split batch across TCs
            vmem_limit_bytes=32 * 1024 * 1024),               # v5e default is only 16 MiB
    )(x, c, bias_pack, *weights)


# --------------------------------------------------------------------------- pure-JAX reference

def reference_forward(source_data, static_embedding, params, *, num_heads, quantiles_num):
    hi = jax.lax.Precision.HIGHEST
    x = source_data                                                   # (B, C, T)

    def conv(inp, w, b, dil):
        Bb, Ci, Tt = inp.shape
        _, _, k = w.shape
        pad = (k - 1) * dil
        xp = jnp.pad(inp, ((0, 0), (0, 0), (pad, 0)))
        cols = jnp.stack([xp[:, :, j * dil: j * dil + Tt] for j in range(k)], axis=2)
        return jnp.einsum("bckt,ock->bot", cols, w, precision=hi) + b[None, :, None]

    for i, lvl in enumerate(params["tcn"]):
        d = 2 ** i
        h = jax.nn.relu(conv(x, lvl["w1"], lvl["b1"], d))
        h = jax.nn.relu(conv(h, lvl["w2"], lvl["b2"], d))
        res = conv(x, lvl["wd"], lvl["bd"], 1) if "wd" in lvl else x
        x = jax.nn.relu(h + res)

    cnn = x.transpose(2, 0, 1)                                        # (T, B, C)
    p = params["grn"]
    H = p["w1"].shape[1]
    a = (jnp.einsum("tbd,dh->tbh", cnn, p["w1"], precision=hi) + p["b1"]
         + (static_embedding @ p["wc"])[None])
    a = jnp.where(a > 0, a, jnp.exp(a) - 1.0)
    hmid = jnp.einsum("tbh,hk->tbk", a, p["w2"], precision=hi) + p["b2"]
    gh = jnp.einsum("tbh,hk->tbk", hmid, p["wg"], precision=hi) + p["bg"]
    glu = gh[..., :H] * jax.nn.sigmoid(gh[..., H:])
    z = jnp.einsum("tbd,dh->tbh", cnn, p["ws"], precision=hi) + p["bs"] + glu
    mu = z.mean(-1, keepdims=True)
    var = ((z - mu) ** 2).mean(-1, keepdims=True)
    z = (z - mu) * jax.lax.rsqrt(var + 1e-5) * p["ln_g"] + p["ln_b"]

    pa = params["attn"]
    S, Bb, Hh = z.shape
    dk = Hh // num_heads
    qkv = jnp.einsum("sbh,hk->sbk", z, pa["in_w"], precision=hi) + pa["in_b"]
    q, k, v = jnp.split(qkv, 3, axis=-1)
    heads = lambda t: t.reshape(S, Bb, num_heads, dk).transpose(1, 2, 0, 3)
    qh, kh, vh = heads(q), heads(k), heads(v)
    s = jnp.einsum("bnqd,bnkd->bnqk", qh, kh, precision=hi) / jnp.sqrt(float(dk))
    pr = jax.nn.softmax(s, axis=-1)
    o = jnp.einsum("bnqk,bnkd->bnqd", pr, vh, precision=hi)
    o = o.transpose(2, 0, 1, 3).reshape(S, Bb, Hh)
    o = jnp.einsum("sbh,hk->sbk", o, pa["out_w"], precision=hi) + pa["out_b"]

    y = jnp.einsum("sbh,hq->sbq", o, params["head"]["w"], precision=hi) + params["head"]["b"]
    y = y.transpose(1, 2, 0)                                          # (B, Q, T)
    mid = quantiles_num // 2
    outs = []
    for i in range(quantiles_num):
        if i < mid:
            outs.append(-jnp.abs(y[:, i:i + 1, :]))
        elif i == mid:
            outs.append(y[:, i:i + 1, :])
        else:
            outs.append(jnp.abs(y[:, i:i + 1, :]))
    return jnp.concatenate(outs, axis=1)


# --------------------------------------------------------------------------- params

def init_params(key, *, cnn_num_inputs, num_channels, hidden, quantiles_num, kernel_size=2):
    keys = iter(jax.random.split(key, 64))

    def nrm(shape, scale=0.1):
        return scale * jax.random.normal(next(keys), shape, jnp.float32)

    p = {}
    tcn = []
    in_ch = cnn_num_inputs
    for out_ch in num_channels:
        lvl = {
            "w1": nrm((out_ch, in_ch, kernel_size)), "b1": nrm((out_ch,)),
            "w2": nrm((out_ch, out_ch, kernel_size)), "b2": nrm((out_ch,)),
        }
        if in_ch != out_ch:
            lvl["wd"] = nrm((out_ch, in_ch, 1))
            lvl["bd"] = nrm((out_ch,))
        tcn.append(lvl)
        in_ch = out_ch
    p["tcn"] = tcn

    D = num_channels[-1]
    p["grn"] = dict(
        w1=nrm((D, hidden)), b1=nrm((hidden,)),
        wc=nrm((hidden, hidden)),
        w2=nrm((hidden, hidden)), b2=nrm((hidden,)),
        wg=nrm((hidden, 2 * hidden)), bg=nrm((2 * hidden,)),
        ws=nrm((D, hidden)), bs=nrm((hidden,)),
        ln_g=jnp.ones((hidden,), jnp.float32), ln_b=jnp.zeros((hidden,), jnp.float32),
    )
    p["attn"] = dict(
        in_w=nrm((hidden, 3 * hidden)), in_b=nrm((3 * hidden,)),
        out_w=nrm((hidden, hidden)), out_b=nrm((hidden,)),
    )
    p["head"] = dict(w=nrm((hidden, quantiles_num)), b=nrm((quantiles_num,)))
    return p


# --------------------------------------------------------------------------- main

if __name__ == "__main__":
    B, CNN_IN, SRC_LEN = 2, 4, 16
    NUM_CHANNELS = [8, 8]
    HIDDEN = 32
    NUM_HEADS = 4
    QUANTILES = 3

    key = jax.random.PRNGKey(0)
    k_par, k_x, k_s = jax.random.split(key, 3)

    params = init_params(k_par, cnn_num_inputs=CNN_IN, num_channels=NUM_CHANNELS,
                         hidden=HIDDEN, quantiles_num=QUANTILES)

    source_data = jax.random.normal(k_x, (B, CNN_IN, SRC_LEN), jnp.float32)   # NCW
    static_embedding = jax.random.normal(k_s, (B, HIDDEN), jnp.float32)

    # compute_dtype=jnp.bfloat16 recommended for MXU operands on v6e/v7x; f32 here
    # for exact parity with the pure-JAX reference at these toy shapes.
    fwd = jax.jit(functools.partial(basics_block_forward,
                                    num_heads=NUM_HEADS, quantiles_num=QUANTILES,
                                    compute_dtype=jnp.float32))
    out = jax.block_until_ready(fwd(source_data, static_embedding, params))

    assert out.shape == (B, QUANTILES, SRC_LEN), out.shape
    assert bool(jnp.all(out[:, 0, :] <= 0.0)) and bool(jnp.all(out[:, 2, :] >= 0.0))

    ref = reference_forward(source_data, static_embedding, params,
                            num_heads=NUM_HEADS, quantiles_num=QUANTILES)
    assert bool(jnp.allclose(out, ref, atol=3e-2, rtol=3e-2)), \
        float(jnp.max(jnp.abs(out - ref)))

    print("KERNEL_OK")
</pallas_src>

<mosaic_0001>
module attributes {stable_mosaic.version = 11 : i64} {
  func.func @kernel(%arg0: i32, %arg1: memref<1x16x4xf32, #tpu.memory_space<vmem>>, %arg2: memref<1x1x32xf32, #tpu.memory_space<vmem>>, %arg3: memref<11x128xf32, #tpu.memory_space<vmem>>, %arg4: memref<4x8xf32, #tpu.memory_space<vmem>>, %arg5: memref<4x8xf32, #tpu.memory_space<vmem>>, %arg6: memref<8x8xf32, #tpu.memory_space<vmem>>, %arg7: memref<8x8xf32, #tpu.memory_space<vmem>>, %arg8: memref<4x8xf32, #tpu.memory_space<vmem>>, %arg9: memref<8x8xf32, #tpu.memory_space<vmem>>, %arg10: memref<8x8xf32, #tpu.memory_space<vmem>>, %arg11: memref<8x8xf32, #tpu.memory_space<vmem>>, %arg12: memref<8x8xf32, #tpu.memory_space<vmem>>, %arg13: memref<8x64xf32, #tpu.memory_space<vmem>>, %arg14: memref<32x32xf32, #tpu.memory_space<vmem>>, %arg15: memref<32x64xf32, #tpu.memory_space<vmem>>, %arg16: memref<32x96xf32, #tpu.memory_space<vmem>>, %arg17: memref<3x32xf32, #tpu.memory_space<vmem>>, %arg18: memref<3x1xf32, #tpu.memory_space<vmem>>, %arg19: memref<1x3x16xf32, #tpu.memory_space<vmem>>, %arg20: memref<16x32xf32, #tpu.memory_space<vmem>>) attributes {dimension_semantics = [#tpu.dimension_semantics<parallel>], iteration_bounds = array<i64: 2>, scalar_prefetch = 0 : i64, scratch_operands = 1 : i64, tpu.core_type = #tpu.core_type<tc>, window_params = [{transform_indices = @transform_0, window_bounds = array<i64: 1, 16, 4>}, {transform_indices = @transform_1, window_bounds = array<i64: 1, 1, 32>}, {pipeline_mode = #tpu.pipeline_mode<synchronous>, transform_indices = @transform_2, window_bounds = array<i64: 11, 128>}, {pipeline_mode = #tpu.pipeline_mode<synchronous>, transform_indices = @transform_3, window_bounds = array<i64: 4, 8>}, {pipeline_mode = #tpu.pipeline_mode<synchronous>, transform_indices = @transform_4, window_bounds = array<i64: 4, 8>}, {pipeline_mode = #tpu.pipeline_mode<synchronous>, transform_indices = @transform_5, window_bounds = array<i64: 8, 8>}, {pipeline_mode = #tpu.pipeline_mode<synchronous>, transform_indices = @transform_6, window_bounds = array<i64: 8, 8>}, {pipeline_mode = #tpu.pipeline_mode<synchronous>, transform_indices = @transform_7, window_bounds = array<i64: 4, 8>}, {pipeline_mode = #tpu.pipeline_mode<synchronous>, transform_indices = @transform_8, window_bounds = array<i64: 8, 8>}, {pipeline_mode = #tpu.pipeline_mode<synchronous>, transform_indices = @transform_9, window_bounds = array<i64: 8, 8>}, {pipeline_mode = #tpu.pipeline_mode<synchronous>, transform_indices = @transform_10, window_bounds = array<i64: 8, 8>}, {pipeline_mode = #tpu.pipeline_mode<synchronous>, transform_indices = @transform_11, window_bounds = array<i64: 8, 8>}, {pipeline_mode = #tpu.pipeline_mode<synchronous>, transform_indices = @transform_12, window_bounds = array<i64: 8, 64>}, {pipeline_mode = #tpu.pipeline_mode<synchronous>, transform_indices = @transform_13, window_bounds = array<i64: 32, 32>}, {pipeline_mode = #tpu.pipeline_mode<synchronous>, transform_indices = @transform_14, window_bounds = array<i64: 32, 64>}, {pipeline_mode = #tpu.pipeline_mode<synchronous>, transform_indices = @transform_15, window_bounds = array<i64: 32, 96>}, {pipeline_mode = #tpu.pipeline_mode<synchronous>, transform_indices = @transform_16, window_bounds = array<i64: 3, 32>}, {pipeline_mode = #tpu.pipeline_mode<synchronous>, transform_indices = @transform_17, window_bounds = array<i64: 3, 1>}, {transform_indices = @transform_18, window_bounds = array<i64: 1, 3, 16>}]} {
    %c0 = arith.constant 0 : index
    %c0_0 = arith.constant 0 : index
    %0 = vector.load %arg3[%c0, %c0_0] : memref<11x128xf32, #tpu.memory_space<vmem>>, vector<11x128xf32>
    %c0_1 = arith.constant 0 : index
    %c0_2 = arith.constant 0 : index
    %c0_3 = arith.constant 0 : index
    %1 = vector.load %arg1[%c0_1, %c0_2, %c0_3] : memref<1x16x4xf32, #tpu.memory_space<vmem>>, vector<1x16x4xf32>
    %2 = vector.shape_cast %1 : vector<1x16x4xf32> to vector<16x4xf32>
    %c1_i32 = arith.constant 1 : i32
    %3 = tpu.dynamic_rotate %2 by %c1_i32 dim 0 : vector<16x4xf32>, i32 -> vector<16x4xf32>
    %4 = tpu.iota {dimensions = array<i32: 0>} : vector<16x4xi32>
    %c1_i32_4 = arith.constant 1 : i32
    %5 = vector.broadcast %c1_i32_4 : i32 to vector<16x4xi32>
    %6 = arith.cmpi slt, %4, %5 : vector<16x4xi32>
    %cst = arith.constant 0.000000e+00 : f32
    %7 = vector.broadcast %cst : f32 to vector<16x4xf32>
    %8 = arith.select %6, %7, %3 : vector<16x4xi1>, vector<16x4xf32>
    %c0_5 = arith.constant 0 : index
    %c0_6 = arith.constant 0 : index
    %9 = vector.load %arg4[%c0_5, %c0_6] : memref<4x8xf32, #tpu.memory_space<vmem>>, vector<4x8xf32>
    %cst_7 = arith.constant dense<0.000000e+00> : vector<16x8xf32>
    %10 = tpu.matmul %8, %9, %cst_7 {dimension_numbers = #tpu.dot_dimension_numbers<[1], [0], [0], [1], [0, 0, 1, 1], [], []>} : vector<16x4xf32>, vector<4x8xf32>, vector<16x8xf32> -> vector<16x8xf32>
    %c0_8 = arith.constant 0 : index
    %c0_9 = arith.constant 0 : index
    %11 = vector.load %arg5[%c0_8, %c0_9] : memref<4x8xf32, #tpu.memory_space<vmem>>, vector<4x8xf32>
    %cst_10 = arith.constant dense<0.000000e+00> : vector<16x8xf32>
    %12 = tpu.matmul %2, %11, %cst_10 {dimension_numbers = #tpu.dot_dimension_numbers<[1], [0], [0], [1], [0, 0, 1, 1], [], []>} : vector<16x4xf32>, vector<4x8xf32>, vector<16x8xf32> -> vector<16x8xf32>
    %13 = arith.addf %10, %12 : vector<16x8xf32>
    %14 = vector.extract_strided_slice %0 {offsets = [0, 0], sizes = [1, 8], strides = [1, 1]} : vector<11x128xf32> to vector<1x8xf32>
    %15 = vector.broadcast %14 : vector<1x8xf32> to vector<16x8xf32>
    %16 = arith.addf %13, %15 : vector<16x8xf32>
    %cst_11 = arith.constant 0.000000e+00 : f32
    %17 = vector.broadcast %cst_11 : f32 to vector<16x8xf32>
    %18 = arith.maximumf %16, %17 : vector<16x8xf32>
    %c1_i32_12 = arith.constant 1 : i32
    %19 = tpu.dynamic_rotate %18 by %c1_i32_12 dim 0 : vector<16x8xf32>, i32 -> vector<16x8xf32>
    %20 = tpu.iota {dimensions = array<i32: 0>} : vector<16x8xi32>
    %c1_i32_13 = arith.constant 1 : i32
    %21 = vector.broadcast %c1_i32_13 : i32 to vector<16x8xi32>
    %22 = arith.cmpi slt, %20, %21 : vector<16x8xi32>
    %cst_14 = arith.constant 0.000000e+00 : f32
    %23 = vector.broadcast %cst_14 : f32 to vector<16x8xf32>
    %24 = arith.select %22, %23, %19 : vector<16x8xi1>, vector<16x8xf32>
    %c0_15 = arith.constant 0 : index
    %c0_16 = arith.constant 0 : index
    %25 = vector.load %arg6[%c0_15, %c0_16] : memref<8x8xf32, #tpu.memory_space<vmem>>, vector<8x8xf32>
    %cst_17 = arith.constant dense<0.000000e+00> : vector<16x8xf32>
    %26 = tpu.matmul %24, %25, %cst_17 {dimension_numbers = #tpu.dot_dimension_numbers<[1], [0], [0], [1], [0, 0, 1, 1], [], []>} : vector<16x8xf32>, vector<8x8xf32>, vector<16x8xf32> -> vector<16x8xf32>
    %c0_18 = arith.constant 0 : index
    %c0_19 = arith.constant 0 : index
    %27 = vector.load %arg7[%c0_18, %c0_19] : memref<8x8xf32, #tpu.memory_space<vmem>>, vector<8x8xf32>
    %cst_20 = arith.constant dense<0.000000e+00> : vector<16x8xf32>
    %28 = tpu.matmul %18, %27, %cst_20 {dimension_numbers = #tpu.dot_dimension_numbers<[1], [0], [0], [1], [0, 0, 1, 1], [], []>} : vector<16x8xf32>, vector<8x8xf32>, vector<16x8xf32> -> vector<16x8xf32>
    %29 = arith.addf %26, %28 : vector<16x8xf32>
    %30 = vector.extract_strided_slice %0 {offsets = [1, 0], sizes = [1, 8], strides = [1, 1]} : vector<11x128xf32> to vector<1x8xf32>
    %31 = vector.broadcast %30 : vector<1x8xf32> to vector<16x8xf32>
    %32 = arith.addf %29, %31 : vector<16x8xf32>
    %cst_21 = arith.constant 0.000000e+00 : f32
    %33 = vector.broadcast %cst_21 : f32 to vector<16x8xf32>
    %34 = arith.maximumf %32, %33 : vector<16x8xf32>
    %c0_22 = arith.constant 0 : index
    %c0_23 = arith.constant 0 : index
    %35 = vector.load %arg8[%c0_22, %c0_23] : memref<4x8xf32, #tpu.memory_space<vmem>>, vector<4x8xf32>
    %cst_24 = arith.constant dense<0.000000e+00> : vector<16x8xf32>
    %36 = tpu.matmul %2, %35, %cst_24 {dimension_numbers = #tpu.dot_dimension_numbers<[1], [0], [0], [1], [0, 0, 1, 1], [], []>} : vector<16x4xf32>, vector<4x8xf32>, vector<16x8xf32> -> vector<16x8xf32>
    %37 = vector.extract_strided_slice %0 {offsets = [2, 0], sizes = [1, 8], strides = [1, 1]} : vector<11x128xf32> to vector<1x8xf32>
    %38 = vector.broadcast %37 : vector<1x8xf32> to vector<16x8xf32>
    %39 = arith.addf %36, %38 : vector<16x8xf32>
    %40 = arith.addf %34, %39 : vector<16x8xf32>
    %cst_25 = arith.constant 0.000000e+00 : f32
    %41 = vector.broadcast %cst_25 : f32 to vector<16x8xf32>
    %42 = arith.maximumf %40, %41 : vector<16x8xf32>
    %c2_i32 = arith.constant 2 : i32
    %43 = tpu.dynamic_rotate %42 by %c2_i32 dim 0 : vector<16x8xf32>, i32 -> vector<16x8xf32>
    %44 = tpu.iota {dimensions = array<i32: 0>} : vector<16x8xi32>
    %c2_i32_26 = arith.constant 2 : i32
    %45 = vector.broadcast %c2_i32_26 : i32 to vector<16x8xi32>
    %46 = arith.cmpi slt, %44, %45 : vector<16x8xi32>
    %cst_27 = arith.constant 0.000000e+00 : f32
    %47 = vector.broadcast %cst_27 : f32 to vector<16x8xf32>
    %48 = arith.select %46, %47, %43 : vector<16x8xi1>, vector<16x8xf32>
    %c0_28 = arith.constant 0 : index
    %c0_29 = arith.constant 0 : index
    %49 = vector.load %arg9[%c0_28, %c0_29] : memref<8x8xf32, #tpu.memory_space<vmem>>, vector<8x8xf32>
    %cst_30 = arith.constant dense<0.000000e+00> : vector<16x8xf32>
    %50 = tpu.matmul %48, %49, %cst_30 {dimension_numbers = #tpu.dot_dimension_numbers<[1], [0], [0], [1], [0, 0, 1, 1], [], []>} : vector<16x8xf32>, vector<8x8xf32>, vector<16x8xf32> -> vector<16x8xf32>
    %c0_31 = arith.constant 0 : index
    %c0_32 = arith.constant 0 : index
    %51 = vector.load %arg10[%c0_31, %c0_32] : memref<8x8xf32, #tpu.memory_space<vmem>>, vector<8x8xf32>
    %cst_33 = arith.constant dense<0.000000e+00> : vector<16x8xf32>
    %52 = tpu.matmul %42, %51, %cst_33 {dimension_numbers = #tpu.dot_dimension_numbers<[1], [0], [0], [1], [0, 0, 1, 1], [], []>} : vector<16x8xf32>, vector<8x8xf32>, vector<16x8xf32> -> vector<16x8xf32>
    %53 = arith.addf %50, %52 : vector<16x8xf32>
    %54 = vector.extract_strided_slice %0 {offsets = [3, 0], sizes = [1, 8], strides = [1, 1]} : vector<11x128xf32> to vector<1x8xf32>
    %55 = vector.broadcast %54 : vector<1x8xf32> to vector<16x8xf32>
    %56 = arith.addf %53, %55 : vector<16x8xf32>
    %cst_34 = arith.constant 0.000000e+00 : f32
    %57 = vector.broadcast %cst_34 : f32 to vector<16x8xf32>
    %58 = arith.maximumf %56, %57 : vector<16x8xf32>
    %c2_i32_35 = arith.constant 2 : i32
    %59 = tpu.dynamic_rotate %58 by %c2_i32_35 dim 0 : vector<16x8xf32>, i32 -> vector<16x8xf32>
    %60 = tpu.iota {dimensions = array<i32: 0>} : vector<16x8xi32>
    %c2_i32_36 = arith.constant 2 : i32
    %61 = vector.broadcast %c2_i32_36 : i32 to vector<16x8xi32>
    %62 = arith.cmpi slt, %60, %61 : vector<16x8xi32>
    %cst_37 = arith.constant 0.000000e+00 : f32
    %63 = vector.broadcast %cst_37 : f32 to vector<16x8xf32>
    %64 = arith.select %62, %63, %59 : vector<16x8xi1>, vector<16x8xf32>
    %c0_38 = arith.constant 0 : index
    %c0_39 = arith.constant 0 : index
    %65 = vector.load %arg11[%c0_38, %c0_39] : memref<8x8xf32, #tpu.memory_space<vmem>>, vector<8x8xf32>
    %cst_40 = arith.constant dense<0.000000e+00> : vector<16x8xf32>
    %66 = tpu.matmul %64, %65, %cst_40 {dimension_numbers = #tpu.dot_dimension_numbers<[1], [0], [0], [1], [0, 0, 1, 1], [], []>} : vector<16x8xf32>, vector<8x8xf32>, vector<16x8xf32> -> vector<16x8xf32>
    %c0_41 = arith.constant 0 : index
    %c0_42 = arith.constant 0 : index
    %67 = vector.load %arg12[%c0_41, %c0_42] : memref<8x8xf32, #tpu.memory_space<vmem>>, vector<8x8xf32>
    %cst_43 = arith.constant dense<0.000000e+00> : vector<16x8xf32>
    %68 = tpu.matmul %58, %67, %cst_43 {dimension_numbers = #tpu.dot_dimension_numbers<[1], [0], [0], [1], [0, 0, 1, 1], [], []>} : vector<16x8xf32>, vector<8x8xf32>, vector<16x8xf32> -> vector<16x8xf32>
    %69 = arith.addf %66, %68 : vector<16x8xf32>
    %70 = vector.extract_strided_slice %0 {offsets = [4, 0], sizes = [1, 8], strides = [1, 1]} : vector<11x128xf32> to vector<1x8xf32>
    %71 = vector.broadcast %70 : vector<1x8xf32> to vector<16x8xf32>
    %72 = arith.addf %69, %71 : vector<16x8xf32>
    %cst_44 = arith.constant 0.000000e+00 : f32
    %73 = vector.broadcast %cst_44 : f32 to vector<16x8xf32>
    %74 = arith.maximumf %72, %73 : vector<16x8xf32>
    %75 = arith.addf %74, %42 : vector<16x8xf32>
    %cst_45 = arith.constant 0.000000e+00 : f32
    %76 = vector.broadcast %cst_45 : f32 to vector<16x8xf32>
    %77 = arith.maximumf %75, %76 : vector<16x8xf32>
    %c0_46 = arith.constant 0 : index
    %c0_47 = arith.constant 0 : index
    %c0_48 = arith.constant 0 : index
    %78 = vector.load %arg2[%c0_46, %c0_47, %c0_48] : memref<1x1x32xf32, #tpu.memory_space<vmem>>, vector<1x1x32xf32>
    %79 = vector.shape_cast %78 : vector<1x1x32xf32> to vector<1x32xf32>
    %c0_49 = arith.constant 0 : index
    %c0_50 = arith.constant 0 : index
    %80 = vector.load %arg13[%c0_49, %c0_50] : memref<8x64xf32, #tpu.memory_space<vmem>>, vector<8x64xf32>
    %cst_51 = arith.constant dense<0.000000e+00> : vector<16x64xf32>
    %81 = tpu.matmul %77, %80, %cst_51 {dimension_numbers = #tpu.dot_dimension_numbers<[1], [0], [0], [1], [0, 0, 1, 1], [], []>} : vector<16x8xf32>, vector<8x64xf32>, vector<16x64xf32> -> vector<16x64xf32>
    %c0_52 = arith.constant 0 : index
    %c0_53 = arith.constant 0 : index
    %82 = vector.load %arg14[%c0_52, %c0_53] : memref<32x32xf32, #tpu.memory_space<vmem>>, vector<32x32xf32>
    %cst_54 = arith.constant dense<0.000000e+00> : vector<1x32xf32>
    %83 = tpu.matmul %79, %82, %cst_54 {dimension_numbers = #tpu.dot_dimension_numbers<[1], [0], [0], [1], [0, 0, 1, 1], [], []>} : vector<1x32xf32>, vector<32x32xf32>, vector<1x32xf32> -> vector<1x32xf32>
    %84 = vector.extract_strided_slice %0 {offsets = [5, 0], sizes = [1, 32], strides = [1, 1]} : vector<11x128xf32> to vector<1x32xf32>
    %85 = arith.addf %83, %84 : vector<1x32xf32>
    %86 = vector.extract_strided_slice %81 {offsets = [0, 0], sizes = [16, 32], strides = [1, 1]} : vector<16x64xf32> to vector<16x32xf32>
    %87 = vector.broadcast %85 : vector<1x32xf32> to vector<16x32xf32>
    %88 = arith.addf %86, %87 : vector<16x32xf32>
    %cst_55 = arith.constant 0.000000e+00 : f32
    %89 = vector.broadcast %cst_55 : f32 to vector<16x32xf32>
    %90 = arith.cmpf ogt, %88, %89 : vector<16x32xf32>
    %91 = math.exp %88 : vector<16x32xf32>
    %cst_56 = arith.constant 1.000000e+00 : f32
    %92 = vector.broadcast %cst_56 : f32 to vector<16x32xf32>
    %93 = arith.subf %91, %92 : vector<16x32xf32>
    %94 = arith.select %90, %88, %93 : vector<16x32xi1>, vector<16x32xf32>
    %c0_57 = arith.constant 0 : index
    %c0_58 = arith.constant 0 : index
    %95 = vector.load %arg15[%c0_57, %c0_58] : memref<32x64xf32, #tpu.memory_space<vmem>>, vector<32x64xf32>
    %cst_59 = arith.constant dense<0.000000e+00> : vector<16x64xf32>
    %96 = tpu.matmul %94, %95, %cst_59 {dimension_numbers = #tpu.dot_dimension_numbers<[1], [0], [0], [1], [0, 0, 1, 1], [], []>} : vector<16x32xf32>, vector<32x64xf32>, vector<16x64xf32> -> vector<16x64xf32>
    %97 = vector.extract_strided_slice %0 {offsets = [7, 0], sizes = [1, 64], strides = [1, 1]} : vector<11x128xf32> to vector<1x64xf32>
    %98 = vector.broadcast %97 : vector<1x64xf32> to vector<16x64xf32>
    %99 = arith.addf %96, %98 : vector<16x64xf32>
    %100 = vector.extract_strided_slice %99 {offsets = [0, 0], sizes = [16, 32], strides = [1, 1]} : vector<16x64xf32> to vector<16x32xf32>
    %101 = vector.extract_strided_slice %99 {offsets = [0, 32], sizes = [16, 32], strides = [1, 1]} : vector<16x64xf32> to vector<16x32xf32>
    %102 = arith.negf %101 : vector<16x32xf32>
    %103 = math.exp %102 : vector<16x32xf32>
    %cst_60 = arith.constant 1.000000e+00 : f32
    %104 = vector.broadcast %cst_60 : f32 to vector<16x32xf32>
    %105 = arith.addf %104, %103 : vector<16x32xf32>
    %106 = arith.divf %104, %105 : vector<16x32xf32>
    %107 = arith.mulf %100, %106 : vector<16x32xf32>
    %108 = vector.extract_strided_slice %81 {offsets = [0, 32], sizes = [16, 32], strides = [1, 1]} : vector<16x64xf32> to vector<16x32xf32>
    %109 = vector.extract_strided_slice %0 {offsets = [6, 0], sizes = [1, 32], strides = [1, 1]} : vector<11x128xf32> to vector<1x32xf32>
    %110 = vector.broadcast %109 : vector<1x32xf32> to vector<16x32xf32>
    %111 = arith.addf %108, %110 : vector<16x32xf32>
    %112 = arith.addf %111, %107 : vector<16x32xf32>
    %cst_61 = arith.constant dense<0.000000e+00> : vector<16xf32>
    %113 = vector.multi_reduction <add>, %112, %cst_61 [1] : vector<16x32xf32> to vector<16xf32>
    %114 = vector.shape_cast %113 : vector<16xf32> to vector<16x1xf32>
    %cst_62 = arith.constant 3.200000e+01 : f32
    %115 = vector.broadcast %cst_62 : f32 to vector<16x1xf32>
    %116 = arith.divf %114, %115 : vector<16x1xf32>
    %117 = vector.broadcast %116 : vector<16x1xf32> to vector<16x32xf32>
    %118 = arith.subf %112, %117 : vector<16x32xf32>
    %119 = arith.mulf %118, %118 : vector<16x32xf32>
    %cst_63 = arith.constant dense<0.000000e+00> : vector<16xf32>
    %120 = vector.multi_reduction <add>, %119, %cst_63 [1] : vector<16x32xf32> to vector<16xf32>
    %121 = vector.shape_cast %120 : vector<16xf32> to vector<16x1xf32>
    %cst_64 = arith.constant 3.200000e+01 : f32
    %122 = vector.broadcast %cst_64 : f32 to vector<16x1xf32>
    %123 = arith.divf %121, %122 : vector<16x1xf32>
    %124 = vector.broadcast %116 : vector<16x1xf32> to vector<16x32xf32>
    %125 = arith.subf %112, %124 : vector<16x32xf32>
    %cst_65 = arith.constant 9.99999974E-6 : f32
    %126 = vector.broadcast %cst_65 : f32 to vector<16x1xf32>
    %127 = arith.addf %123, %126 : vector<16x1xf32>
    %128 = math.rsqrt %127 : vector<16x1xf32>
    %129 = vector.broadcast %128 : vector<16x1xf32> to vector<16x32xf32>
    %130 = arith.mulf %125, %129 : vector<16x32xf32>
    %131 = vector.extract_strided_slice %0 {offsets = [8, 0], sizes = [1, 32], strides = [1, 1]} : vector<11x128xf32> to vector<1x32xf32>
    %132 = vector.broadcast %131 : vector<1x32xf32> to vector<16x32xf32>
    %133 = arith.mulf %130, %132 : vector<16x32xf32>
    %134 = vector.extract_strided_slice %0 {offsets = [9, 0], sizes = [1, 32], strides = [1, 1]} : vector<11x128xf32> to vector<1x32xf32>
    %135 = vector.broadcast %134 : vector<1x32xf32> to vector<16x32xf32>
    %136 = arith.addf %133, %135 : vector<16x32xf32>
    %c0_66 = arith.constant 0 : index
    %c0_67 = arith.constant 0 : index
    %137 = vector.load %arg16[%c0_66, %c0_67] : memref<32x96xf32, #tpu.memory_space<vmem>>, vector<32x96xf32>
    %cst_68 = arith.constant dense<0.000000e+00> : vector<16x96xf32>
    %138 = tpu.matmul %136, %137, %cst_68 {dimension_numbers = #tpu.dot_dimension_numbers<[1], [0], [0], [1], [0, 0, 1, 1], [], []>} : vector<16x32xf32>, vector<32x96xf32>, vector<16x96xf32> -> vector<16x96xf32>
    %139 = vector.extract_strided_slice %0 {offsets = [10, 0], sizes = [1, 96], strides = [1, 1]} : vector<11x128xf32> to vector<1x96xf32>
    %140 = vector.broadcast %139 : vector<1x96xf32> to vector<16x96xf32>
    %141 = arith.addf %138, %140 : vector<16x96xf32>
    %142 = vector.extract_strided_slice %141 {offsets = [0, 0], sizes = [16, 8], strides = [1, 1]} : vector<16x96xf32> to vector<16x8xf32>
    %143 = vector.extract_strided_slice %141 {offsets = [0, 32], sizes = [16, 8], strides = [1, 1]} : vector<16x96xf32> to vector<16x8xf32>
    %144 = vector.extract_strided_slice %141 {offsets = [0, 64], sizes = [16, 8], strides = [1, 1]} : vector<16x96xf32> to vector<16x8xf32>
    %cst_69 = arith.constant dense<0.000000e+00> : vector<16x16xf32>
    %145 = tpu.matmul %142, %143, %cst_69 {dimension_numbers = #tpu.dot_dimension_numbers<[1], [1], [0], [0], [0, 0, 1, 0], [], []>} : vector<16x8xf32>, vector<16x8xf32>, vector<16x16xf32> -> vector<16x16xf32>
    %cst_70 = arith.constant dense<0xFF800000> : vector<16xf32>
    %146 = vector.multi_reduction <maximumf>, %145, %cst_70 [1] : vector<16x16xf32> to vector<16xf32>
    %147 = vector.shape_cast %146 : vector<16xf32> to vector<16x1xf32>
    %148 = vector.broadcast %147 : vector<16x1xf32> to vector<16x16xf32>
    %149 = arith.subf %145, %148 : vector<16x16xf32>
    %150 = math.exp %149 : vector<16x16xf32>
    %cst_71 = arith.constant dense<0.000000e+00> : vector<16xf32>
    %151 = vector.multi_reduction <add>, %150, %cst_71 [1] : vector<16x16xf32> to vector<16xf32>
    %152 = vector.shape_cast %151 : vector<16xf32> to vector<16x1xf32>
    %153 = vector.broadcast %152 : vector<16x1xf32> to vector<16x16xf32>
    %154 = arith.divf %150, %153 : vector<16x16xf32>
    %cst_72 = arith.constant dense<0.000000e+00> : vector<16x8xf32>
    %155 = tpu.matmul %154, %144, %cst_72 {dimension_numbers = #tpu.dot_dimension_numbers<[1], [0], [0], [1], [0, 0, 1, 1], [], []>} : vector<16x16xf32>, vector<16x8xf32>, vector<16x8xf32> -> vector<16x8xf32>
    %c0_73 = arith.constant 0 : index
    %c0_74 = arith.constant 0 : index
    %156 = vector.load %arg20[%c0_73, %c0_74] : memref<16x32xf32, #tpu.memory_space<vmem>>, vector<16x8xf32>
    tpu.vector_store %arg20[%c0_73, %c0_74], %155 {strides = array<i32>} : memref<16x32xf32, #tpu.memory_space<vmem>>, vector<16x8xf32>,
    %157 = vector.extract_strided_slice %141 {offsets = [0, 8], sizes = [16, 8], strides = [1, 1]} : vector<16x96xf32> to vector<16x8xf32>
    %158 = vector.extract_strided_slice %141 {offsets = [0, 40], sizes = [16, 8], strides = [1, 1]} : vector<16x96xf32> to vector<16x8xf32>
    %159 = vector.extract_strided_slice %141 {offsets = [0, 72], sizes = [16, 8], strides = [1, 1]} : vector<16x96xf32> to vector<16x8xf32>
    %cst_75 = arith.constant dense<0.000000e+00> : vector<16x16xf32>
    %160 = tpu.matmul %157, %158, %cst_75 {dimension_numbers = #tpu.dot_dimension_numbers<[1], [1], [0], [0], [0, 0, 1, 0], [], []>} : vector<16x8xf32>, vector<16x8xf32>, vector<16x16xf32> -> vector<16x16xf32>
    %cst_76 = arith.constant dense<0xFF800000> : vector<16xf32>
    %161 = vector.multi_reduction <maximumf>, %160, %cst_76 [1] : vector<16x16xf32> to vector<16xf32>
    %162 = vector.shape_cast %161 : vector<16xf32> to vector<16x1xf32>
    %163 = vector.broadcast %162 : vector<16x1xf32> to vector<16x16xf32>
    %164 = arith.subf %160, %163 : vector<16x16xf32>
    %165 = math.exp %164 : vector<16x16xf32>
    %cst_77 = arith.constant dense<0.000000e+00> : vector<16xf32>
    %166 = vector.multi_reduction <add>, %165, %cst_77 [1] : vector<16x16xf32> to vector<16xf32>
    %167 = vector.shape_cast %166 : vector<16xf32> to vector<16x1xf32>
    %168 = vector.broadcast %167 : vector<16x1xf32> to vector<16x16xf32>
    %169 = arith.divf %165, %168 : vector<16x16xf32>
    %cst_78 = arith.constant dense<0.000000e+00> : vector<16x8xf32>
    %170 = tpu.matmul %169, %159, %cst_78 {dimension_numbers = #tpu.dot_dimension_numbers<[1], [0], [0], [1], [0, 0, 1, 1], [], []>} : vector<16x16xf32>, vector<16x8xf32>, vector<16x8xf32> -> vector<16x8xf32>
    %c0_79 = arith.constant 0 : index
    %c8 = arith.constant 8 : index
    %171 = vector.load %arg20[%c0_79, %c8] : memref<16x32xf32, #tpu.memory_space<vmem>>, vector<16x8xf32>
    tpu.vector_store %arg20[%c0_79, %c8], %170 {strides = array<i32>} : memref<16x32xf32, #tpu.memory_space<vmem>>, vector<16x8xf32>,
    %172 = vector.extract_strided_slice %141 {offsets = [0, 16], sizes = [16, 8], strides = [1, 1]} : vector<16x96xf32> to vector<16x8xf32>
    %173 = vector.extract_strided_slice %141 {offsets = [0, 48], sizes = [16, 8], strides = [1, 1]} : vector<16x96xf32> to vector<16x8xf32>
    %174 = vector.extract_strided_slice %141 {offsets = [0, 80], sizes = [16, 8], strides = [1, 1]} : vector<16x96xf32> to vector<16x8xf32>
    %cst_80 = arith.constant dense<0.000000e+00> : vector<16x16xf32>
    %175 = tpu.matmul %172, %173, %cst_80 {dimension_numbers = #tpu.dot_dimension_numbers<[1], [1], [0], [0], [0, 0, 1, 0], [], []>} : vector<16x8xf32>, vector<16x8xf32>, vector<16x16xf32> -> vector<16x16xf32>
    %cst_81 = arith.constant dense<0xFF800000> : vector<16xf32>
    %176 = vector.multi_reduction <maximumf>, %175, %cst_81 [1] : vector<16x16xf32> to vector<16xf32>
    %177 = vector.shape_cast %176 : vector<16xf32> to vector<16x1xf32>
    %178 = vector.broadcast %177 : vector<16x1xf32> to vector<16x16xf32>
    %179 = arith.subf %175, %178 : vector<16x16xf32>
    %180 = math.exp %179 : vector<16x16xf32>
    %cst_82 = arith.constant dense<0.000000e+00> : vector<16xf32>
    %181 = vector.multi_reduction <add>, %180, %cst_82 [1] : vector<16x16xf32> to vector<16xf32>
    %182 = vector.shape_cast %181 : vector<16xf32> to vector<16x1xf32>
    %183 = vector.broadcast %182 : vector<16x1xf32> to vector<16x16xf32>
    %184 = arith.divf %180, %183 : vector<16x16xf32>
    %cst_83 = arith.constant dense<0.000000e+00> : vector<16x8xf32>
    %185 = tpu.matmul %184, %174, %cst_83 {dimension_numbers = #tpu.dot_dimension_numbers<[1], [0], [0], [1], [0, 0, 1, 1], [], []>} : vector<16x16xf32>, vector<16x8xf32>, vector<16x8xf32> -> vector<16x8xf32>
    %c0_84 = arith.constant 0 : index
    %c16 = arith.constant 16 : index
    %186 = vector.load %arg20[%c0_84, %c16] : memref<16x32xf32, #tpu.memory_space<vmem>>, vector<16x8xf32>
    tpu.vector_store %arg20[%c0_84, %c16], %185 {strides = array<i32>} : memref<16x32xf32, #tpu.memory_space<vmem>>, vector<16x8xf32>,
    %187 = vector.extract_strided_slice %141 {offsets = [0, 24], sizes = [16, 8], strides = [1, 1]} : vector<16x96xf32> to vector<16x8xf32>
    %188 = vector.extract_strided_slice %141 {offsets = [0, 56], sizes = [16, 8], strides = [1, 1]} : vector<16x96xf32> to vector<16x8xf32>
    %189 = vector.extract_strided_slice %141 {offsets = [0, 88], sizes = [16, 8], strides = [1, 1]} : vector<16x96xf32> to vector<16x8xf32>
    %cst_85 = arith.constant dense<0.000000e+00> : vector<16x16xf32>
    %190 = tpu.matmul %187, %188, %cst_85 {dimension_numbers = #tpu.dot_dimension_numbers<[1], [1], [0], [0], [0, 0, 1, 0], [], []>} : vector<16x8xf32>, vector<16x8xf32>, vector<16x16xf32> -> vector<16x16xf32>
    %cst_86 = arith.constant dense<0xFF800000> : vector<16xf32>
    %191 = vector.multi_reduction <maximumf>, %190, %cst_86 [1] : vector<16x16xf32> to vector<16xf32>
    %192 = vector.shape_cast %191 : vector<16xf32> to vector<16x1xf32>
    %193 = vector.broadcast %192 : vector<16x1xf32> to vector<16x16xf32>
    %194 = arith.subf %190, %193 : vector<16x16xf32>
    %195 = math.exp %194 : vector<16x16xf32>
    %cst_87 = arith.constant dense<0.000000e+00> : vector<16xf32>
    %196 = vector.multi_reduction <add>, %195, %cst_87 [1] : vector<16x16xf32> to vector<16xf32>
    %197 = vector.shape_cast %196 : vector<16xf32> to vector<16x1xf32>
    %198 = vector.broadcast %197 : vector<16x1xf32> to vector<16x16xf32>
    %199 = arith.divf %195, %198 : vector<16x16xf32>
    %cst_88 = arith.constant dense<0.000000e+00> : vector<16x8xf32>
    %200 = tpu.matmul %199, %189, %cst_88 {dimension_numbers = #tpu.dot_dimension_numbers<[1], [0], [0], [1], [0, 0, 1, 1], [], []>} : vector<16x16xf32>, vector<16x8xf32>, vector<16x8xf32> -> vector<16x8xf32>
    %c0_89 = arith.constant 0 : index
    %c24 = arith.constant 24 : index
    %201 = vector.load %arg20[%c0_89, %c24] : memref<16x32xf32, #tpu.memory_space<vmem>>, vector<16x8xf32>
    tpu.vector_store %arg20[%c0_89, %c24], %200 {strides = array<i32>} : memref<16x32xf32, #tpu.memory_space<vmem>>, vector<16x8xf32>,
    %c0_90 = arith.constant 0 : index
    %c0_91 = arith.constant 0 : index
    %202 = vector.load %arg20[%c0_90, %c0_91] : memref<16x32xf32, #tpu.memory_space<vmem>>, vector<16x32xf32>
    %c0_92 = arith.constant 0 : index
    %c0_93 = arith.constant 0 : index
    %203 = vector.load %arg17[%c0_92, %c0_93] : memref<3x32xf32, #tpu.memory_space<vmem>>, vector<3x32xf32>
    %cst_94 = arith.constant dense<0.000000e+00> : vector<3x16xf32>
    %204 = tpu.matmul %203, %202, %cst_94 {dimension_numbers = #tpu.dot_dimension_numbers<[1], [1], [0], [0], [0, 0, 1, 0], [], []>} : vector<3x32xf32>, vector<16x32xf32>, vector<3x16xf32> -> vector<3x16xf32>
    %c0_95 = arith.constant 0 : index
    %c0_96 = arith.constant 0 : index
    %205 = vector.load %arg18[%c0_95, %c0_96] : memref<3x1xf32, #tpu.memory_space<vmem>>, vector<3x1xf32>
    %206 = vector.broadcast %205 : vector<3x1xf32> to vector<3x16xf32>
    %207 = arith.addf %204, %206 : vector<3x16xf32>
    %208 = tpu.iota {dimensions = array<i32: 0>} : vector<3x16xi32>
    %209 = math.absf %207 : vector<3x16xf32>
    %c1_i32_97 = arith.constant 1 : i32
    %210 = vector.broadcast %c1_i32_97 : i32 to vector<3x16xi32>
    %211 = arith.cmpi slt, %208, %210 : vector<3x16xi32>
    %cst_98 = arith.constant 0.000000e+00 : f32
    %212 = vector.broadcast %cst_98 : f32 to vector<3x16xf32>
    %213 = arith.subf %212, %209 : vector<3x16xf32>
    %c1_i32_99 = arith.constant 1 : i32
    %214 = vector.broadcast %c1_i32_99 : i32 to vector<3x16xi32>
    %215 = arith.cmpi eq, %208, %214 : vector<3x16xi32>
    %216 = arith.select %215, %207, %209 : vector<3x16xi1>, vector<3x16xf32>
    %217 = arith.select %211, %213, %216 : vector<3x16xi1>, vector<3x16xf32>
    %c0_100 = arith.constant 0 : index
    %c0_101 = arith.constant 0 : index
    %c0_102 = arith.constant 0 : index
    %218 = vector.load %arg19[%c0_100, %c0_101, %c0_102] : memref<1x3x16xf32, #tpu.memory_space<vmem>>, vector<1x3x16xf32>
    %219 = vector.shape_cast %218 : vector<1x3x16xf32> to vector<3x16xf32>
    %220 = vector.shape_cast %217 : vector<3x16xf32> to vector<1x3x16xf32>
    tpu.vector_store %arg19[%c0_100, %c0_101, %c0_102], %220 {strides = array<i32>} : memref<1x3x16xf32, #tpu.memory_space<vmem>>, vector<1x3x16xf32>,
    return
  }
  func.func @transform_0(%arg0: i32) -> (i32, i32, i32) {
    %c0_i32 = arith.constant 0 : i32
    %c0_i32_0 = arith.constant 0 : i32
    %c0_i32_1 = arith.constant 0 : i32
    return %arg0, %c0_i32, %c0_i32_0 : i32, i32, i32
  }
  func.func @transform_1(%arg0: i32) -> (i32, i32, i32) {
    %c0_i32 = arith.constant 0 : i32
    %c0_i32_0 = arith.constant 0 : i32
    %c0_i32_1 = arith.constant 0 : i32
    return %arg0, %c0_i32, %c0_i32_0 : i32, i32, i32
  }
  func.func @transform_2(%arg0: i32) -> (i32, i32) {
    %c0_i32 = arith.constant 0 : i32
    %c0_i32_0 = arith.constant 0 : i32
    %c0_i32_1 = arith.constant 0 : i32
    return %c0_i32, %c0_i32_0 : i32, i32
  }
  func.func @transform_3(%arg0: i32) -> (i32, i32) {
    %c0_i32 = arith.constant 0 : i32
    %c0_i32_0 = arith.constant 0 : i32
    %c0_i32_1 = arith.constant 0 : i32
    return %c0_i32, %c0_i32_0 : i32, i32
  }
  func.func @transform_4(%arg0: i32) -> (i32, i32) {
    %c0_i32 = arith.constant 0 : i32
    %c0_i32_0 = arith.constant 0 : i32
    %c0_i32_1 = arith.constant 0 : i32
    return %c0_i32, %c0_i32_0 : i32, i32
  }
  func.func @transform_5(%arg0: i32) -> (i32, i32) {
    %c0_i32 = arith.constant 0 : i32
    %c0_i32_0 = arith.constant 0 : i32
    %c0_i32_1 = arith.constant 0 : i32
    return %c0_i32, %c0_i32_0 : i32, i32
  }
  func.func @transform_6(%arg0: i32) -> (i32, i32) {
    %c0_i32 = arith.constant 0 : i32
    %c0_i32_0 = arith.constant 0 : i32
    %c0_i32_1 = arith.constant 0 : i32
    return %c0_i32, %c0_i32_0 : i32, i32
  }
  func.func @transform_7(%arg0: i32) -> (i32, i32) {
    %c0_i32 = arith.constant 0 : i32
    %c0_i32_0 = arith.constant 0 : i32
    %c0_i32_1 = arith.constant 0 : i32
    return %c0_i32, %c0_i32_0 : i32, i32
  }
  func.func @transform_8(%arg0: i32) -> (i32, i32) {
    %c0_i32 = arith.constant 0 : i32
    %c0_i32_0 = arith.constant 0 : i32
    %c0_i32_1 = arith.constant 0 : i32
    return %c0_i32, %c0_i32_0 : i32, i32
  }
  func.func @transform_9(%arg0: i32) -> (i32, i32) {
    %c0_i32 = arith.constant 0 : i32
    %c0_i32_0 = arith.constant 0 : i32
    %c0_i32_1 = arith.constant 0 : i32
    return %c0_i32, %c0_i32_0 : i32, i32
  }
  func.func @transform_10(%arg0: i32) -> (i32, i32) {
    %c0_i32 = arith.constant 0 : i32
    %c0_i32_0 = arith.constant 0 : i32
    %c0_i32_1 = arith.constant 0 : i32
    return %c0_i32, %c0_i32_0 : i32, i32
  }
  func.func @transform_11(%arg0: i32) -> (i32, i32) {
    %c0_i32 = arith.constant 0 : i32
    %c0_i32_0 = arith.constant 0 : i32
    %c0_i32_1 = arith.constant 0 : i32
    return %c0_i32, %c0_i32_0 : i32, i32
  }
  func.func @transform_12(%arg0: i32) -> (i32, i32) {
    %c0_i32 = arith.constant 0 : i32
    %c0_i32_0 = arith.constant 0 : i32
    %c0_i32_1 = arith.constant 0 : i32
    return %c0_i32, %c0_i32_0 : i32, i32
  }
  func.func @transform_13(%arg0: i32) -> (i32, i32) {
    %c0_i32 = arith.constant 0 : i32
    %c0_i32_0 = arith.constant 0 : i32
    %c0_i32_1 = arith.constant 0 : i32
    return %c0_i32, %c0_i32_0 : i32, i32
  }
  func.func @transform_14(%arg0: i32) -> (i32, i32) {
    %c0_i32 = arith.constant 0 : i32
    %c0_i32_0 = arith.constant 0 : i32
    %c0_i32_1 = arith.constant 0 : i32
    return %c0_i32, %c0_i32_0 : i32, i32
  }
  func.func @transform_15(%arg0: i32) -> (i32, i32) {
    %c0_i32 = arith.constant 0 : i32
    %c0_i32_0 = arith.constant 0 : i32
    %c0_i32_1 = arith.constant 0 : i32
    return %c0_i32, %c0_i32_0 : i32, i32
  }
  func.func @transform_16(%arg0: i32) -> (i32, i32) {
    %c0_i32 = arith.constant 0 : i32
    %c0_i32_0 = arith.constant 0 : i32
    %c0_i32_1 = arith.constant 0 : i32
    return %c0_i32, %c0_i32_0 : i32, i32
  }
  func.func @transform_17(%arg0: i32) -> (i32, i32) {
    %c0_i32 = arith.constant 0 : i32
    %c0_i32_0 = arith.constant 0 : i32
    %c0_i32_1 = arith.constant 0 : i32
    return %c0_i32, %c0_i32_0 : i32, i32
  }
  func.func @transform_18(%arg0: i32) -> (i32, i32, i32) {
    %c0_i32 = arith.constant 0 : i32
    %c0_i32_0 = arith.constant 0 : i32
    %c0_i32_1 = arith.constant 0 : i32
    return %arg0, %c0_i32, %c0_i32_0 : i32, i32, i32
  }
}

</mosaic_0001>

<bundles_post_ra>
// kernel: basics_block_forward.1
= control target key start
LH: loop header
LB: loop body
LE: loop exit
PB: predicated region body
PF: predicated region fallthrough
CT: control target
= control target key end

     0   :  { %s3480_s27 = smov 0   ;;  %s3801_s0 = inlined_call_operand.vmem [shape: f32[2,16,4], index: 0, kind: input, shape index: {}]   ;;  %s3802_s1 = inlined_call_operand.vmem [shape: f32[2,1,32], index: 1, kind: input, shape index: {}]   ;;  %s3803_s2 = inlined_call_operand.vmem [shape: f32[11,128], index: 2, kind: input, shape index: {}]   ;;  %s3804_s3 = inlined_call_operand.vmem [shape: f32[4,8], index: 3, kind: input, shape index: {}]   ;;  %s3805_s4 = inlined_call_operand.vmem [shape: f32[4,8], index: 4, kind: input, shape index: {}]   ;;  %s3806_s5 = inlined_call_operand.vmem [shape: f32[8,8], index: 5, kind: input, shape index: {}]   ;;  %s3807_s6 = inlined_call_operand.vmem [shape: f32[8,8], index: 6, kind: input, shape index: {}]   ;;  %s3808_s7 = inlined_call_operand.vmem [shape: f32[4,8], index: 7, kind: input, shape index: {}]   ;;  %s3809_s8 = inlined_call_operand.vmem [shape: f32[8,8], index: 8, kind: input, shape index: {}]   ;;  %s3810_s9 = inlined_call_operand.vmem [shape: f32[8,8], index: 9, kind: input, shape index: {}]   ;;  %s3811_s10 = inlined_call_operand.vmem [shape: f32[8,8], index: 10, kind: input, shape index: {}]   ;;  %s3812_s11 = inlined_call_operand.vmem [shape: f32[8,8], index: 11, kind: input, shape index: {}]   ;;  %s3813_s12 = inlined_call_operand.vmem [shape: f32[8,64], index: 12, kind: input, shape index: {}]   ;;  %s3814_s13 = inlined_call_operand.vmem [shape: f32[32,32], index: 13, kind: input, shape index: {}]   ;;  %s3815_s14 = inlined_call_operand.vmem [shape: f32[32,64], index: 14, kind: input, shape index: {}]   ;;  %s3816_s15 = inlined_call_operand.vmem [shape: f32[32,96], index: 15, kind: input, shape index: {}]   ;;  %s3817_s16 = inlined_call_operand.vmem [shape: f32[3,32], index: 16, kind: input, shape index: {}]   ;;  %s3818_s17 = inlined_call_operand.vmem [shape: f32[3,1], index: 17, kind: input, shape index: {}]   ;;  %s3819_s18 = inlined_call_operand.vmem [shape: f32[2,3,16], index: 18, kind: output, shape index: {}]  }
   0x1   :  { %3821 = sst [smem:[#allocation3_spill]] %s3801_s0 }
   0x2   :  { %3822 = sst [smem:[#allocation4_spill]] %s3802_s1 }
   0x3   :  { %3823 = sst [smem:[#allocation5_spill]] %s3803_s2 }
   0x4 LB: > { %s2869_s28 = sadd.s32 4294967295, %s3364_s27   ;;  %p2873_p0 = scmp.ge.s32.totalorder %s3364_s27, 1  ;;  %s3364_s27 = sphi %s3480_s27, %s28_s27  }
   0x5   : > { %p520_p1 = scmp.lt.s32.totalorder %s3364_s27, 3 }
   0x7   : > { %p521_p2 = pnand %p2873_p0, %p520_p1 }
   0x8   : > { %v604_v0 = vld [vmem:[%s3805_s4] sm:$0xf] (!%p521_p2)  ;;  %vm612_vm0 = vcmask (!%p521_p2), 1043456   ;;  %p576_p3 = scmp.lt.s32.totalorder (!%p521_p2), %s2869_s28, 1  ;;  %v594_v1 = vlaneseq (!%p521_p2)  ;;  %vm605_vm1 = vcmask (!%p521_p2), 31744   ;;  %s3824_s22 = sld [smem:[#allocation3_spill]] (!%p521_p2) }
   0x9   : > { %524 = sbr.rel (%p521_p2) target bundleno = 4830 (0x12de), region = 92  ;;  %3021 = vmatprep.subr.msk.mxu1 (!%p521_p2), %vm612_vm0, %v604_v0  ;;  %v603_v2 = vld [vmem:[%s3804_s3] sm:$0xf] (!%p521_p2)  ;;  %vm791_vm3 = vcmask (!%p521_p2), 64512   ;;  %s3826_s25 = sld [smem:[#allocation4_spill]] (!%p521_p2)  ;;  %vm3367_vm5 = vmmov (!%p521_p2), 0  }
   0xa   : > { %3022 = vmatpush3.msk.msra.mxu1 (!%p521_p2), %vm612_vm0, %v604_v0  ;;  %3026 = vmatprep.subr.msk.mxu0 (!%p521_p2), %vm612_vm0, %v603_v2  ;;  %v3499_v3 = vshrl.u32 (!%p521_p2), %v594_v1, 7  ;;  %v790_v11 = vld [vmem:[%s3807_s6] sm:$0xff] (!%p521_p2)  ;;  %vm1501_vm6 = vcmask (!%p521_p2), 261120   ;;  %s3369_s0 = smov (!%p521_p2), 32   ;;  %s3372_s29 = smov (!%p521_p2), 120   ;;  %vm3707_vm9 = vmpackc.low (!%p521_p2), %vm791_vm3, %vm791_vm3  ;;  %vm1967_vm10 = vcmask (!%p521_p2), 130048  }
   0xb   : > { %3027 = vmatpush3.msk.msra.mxu0 (!%p521_p2), %vm612_vm0, %v603_v2  ;;  %3031 = vmatprep.subr.mxu1 (!%p521_p2), %v790_v11  ;;  %v789_v12 = vld [vmem:[%s3806_s5] sm:$0xff] (!%p521_p2)  ;;  %s3374_s30 = smov (!%p521_p2), 80   ;;  %s3375_s19 = smov (!%p521_p2), 64   ;;  %vm2287_vm11 = vcmask (!%p521_p2), 130112   ;;  %vm2498_vm12 = vcmask (!%p521_p2), 195712   ;;  %vm2709_vm13 = vcmask (!%p521_p2), 261312   ;;  %vm3231_vm14 = vmpackc.low (!%p521_p2), %vm1501_vm6, %vm1501_vm6 }
   0xc   : > { %vm596_vm2 = vcmp.lt.s32.totalorder (!%p521_p2), %v3499_v3, 1  ;;  %v962_v13 = vld [vmem:[%s3808_s7] sm:$0xf] (!%p521_p2)  ;;  %v3531_v14 = vsub.s32 (!%p521_p2), 0, %v3499_v3  ;;  %v956_v36 = vsub.s32 (!%p521_p2), 1, %v3499_v3  ;;  %v965_v37 = vsub.s32 (!%p521_p2), 2, %v3499_v3 }
   0xd   : > { %3041 = vmatprep.subr.msk.mxu0 (!%p521_p2), %vm612_vm0, %v962_v13  ;;  %v1058_v34 = vld [vmem:[%s3810_s9] sm:$0xff] (!%p521_p2)  ;;  %vm1051_vm4 = vcmp.lt.s32.totalorder (!%p521_p2), %v3499_v3, 2  ;;  %v1223_v59 = vsub.s32 (!%p521_p2), 3, %v3499_v3  ;;  %s3376_s20 = smov (!%p521_p2), 112   ;;  %s3377_s21 = smov (!%p521_p2), 48   ;;  %vm2802_vm15 = vcmp.eq.s32.totalorder (!%p521_p2), %v3499_v3, 1 }
   0xe   : > { %v1057_v35 = vld [vmem:[%s3809_s8] sm:$0xff] (!%p521_p2)  ;;  %s3380_s23 = smov (!%p521_p2), 40   ;;  %s3382_s24 = smov (!%p521_p2), 16  }
   0xf   : > { %v1236_v57 = vld [vmem:[%s3812_s11] sm:$0xff] (!%p521_p2) }
  0x10   : > { %s3830_s28 = smov (!%p576_p3, %s2869_s28), 1  ;;  %v1235_v58 = vld [vmem:[%s3811_s10] sm:$0xff] }
  0x11   : > { %s2938_s1 = sshll.u32 %s3830_s28, 4  ;;  %s583_s26 = scalar_lea.vmem %s3826_s25, %s3830_s28 }
  0x12   : > { %s580_s2 = scalar_lea.vmem %s3824_s22, %s2938_s1  ;;  %s3825_s1 = sld [smem:[#allocation5_spill]] }
  0x13   : > { %v590_v4 = vld [vmem:[%s580_s2] sm:$0xff]  ;;  %v591_v5 = vld [vmem:[%s580_s2 + $0x8] sm:$0xff]  ;;  %s3371_s25 = smov 88   ;;  %s3378_s22 = smov 104  }
  0x14   : > { %v592_v6 = vrot.slane %v590_v4, 7  ;;  %3023 = vmatprep.mubr.msk.f32.mxu1 %vm605_vm1, %v590_v4  ;;  %v593_v7 = vrot.slane %v591_v5, 7  ;;  %s3379_s2 = smov 72  }
  0x15   : > { %3024 = vmatmul.mubr.msk.f32.vlgmr.msra.gmra.mrb[0].mxu1 %vm605_vm1, %v591_v5 }
  0x16   : > { %v598_v8 = vsel %vm596_vm2, %v593_v7, %v592_v6  ;;  %v597_v9 = vsel %vm596_vm2, %v592_v6, %v593_v7  ;;  %3032 = vmatpush3.msra.mxu1 %v790_v11  ;;  %v1495_v11 = vld [vmem:[%s3814_s13 + $0x8] sm:$0xff] }
  0x17   : > { %v601_v10 = vsel %vm596_vm2, 0.0, %v598_v8  ;;  %3036 = vmatprep.subr.mxu1 %v789_v12 }
  0x18   : > { %3028 = vmatprep.mubr.msk.f32.mxu0 %vm605_vm1, %v601_v10  ;;  %v3536_v16 = vld [vmem:[%s3825_s1] sm:$0xff] }
  0x19   : > { %3029 = vmatmul.mubr.msk.f32.vlgmr.msra.gmra.mrb[0].mxu0 %vm605_vm1, %v597_v9  ;;  %v778_v18 = vrot.slane %v3536_v16, %v3531_v14  ;;  %v957_v38 = vrot.slane %v3536_v16, %v956_v36  ;;  %v966_v39 = vrot.slane %v3536_v16, %v965_v37  ;;  %v1224_v60 = vrot.slane %v3536_v16, %v1223_v59  ;;  %v1494_v10 = vld [vmem:[%s3814_s13] sm:$0xff] }
  0x1a   : > { %3043 = vmatprep.mubr.msk.f32.mxu0 %vm605_vm1, %v590_v4  ;;  %3042 = vmatpush3.msk.msra.mxu0 %vm612_vm0, %v962_v13  ;;  %v3366_v9 = vmov 0.0|0.0   ;;  %v1496_v13 = vld [vmem:[%s3814_s13 + $0x10] sm:$0xff]  ;;  %vm2805_vm0 = vcmask 124928  }
  0x1b   : > { %3056 = vmatprep.subr.mxu0 %v1236_v57 }
  0x1d   : > { %3044 = vmatmul.mubr.msk.f32.vlgmr.msra.gmra.mrb[2].mxu0 %vm605_vm1, %v591_v5 }
  0x1e   : > { %3057 = vmatpush3.msra.mxu0 %v1236_v57 }
  0x1f   : > { %3061 = vmatprep.subr.mxu0 %v1235_v58 }
  0xe8   : > { %v3025_v15 = vpop.f32.mrb[0].mxu1 }
  0xe9   : > { %v682_v17 = vpop.f32.mrb[1].mxu1 }
  0xec   : > { %v3030_v19 = vpop.f32.mrb[0].mxu0 }
  0xed   : > { %v772_v20 = vadd.f32 %v3030_v19, %v3025_v15  ;;  %v766_v21 = vpop.f32.mrb[1].mxu0  ;;  %v1497_v15 = vld [vmem:[%s3814_s13 + $0x18] sm:$0xff]  ;;  %v1411_v19 = vld [vmem:[%s583_s26] sm:$0x1]  ;;  %s3370_s26 = smov 96  }
  0xee   : > { %v767_v22 = vadd.f32 %v766_v21, %v682_v17  ;;  %v3171_v17 = vpack.c.bf16 %v1497_v15, %v1496_v13  ;;  %v1704_v21 = vsub.s32 6, %v3499_v3 }
  0xef   : > { %v780_v23 = vadd.f32 %v778_v18, %v772_v20  ;;  %v1412_v20 = vld [vmem:[%s3813_s12] sm:$0xff] }
  0xf0   : > { %v779_v24 = vadd.f32 %v778_v18, %v767_v22  ;;  %v3045_v32 = vpop.f32.mrb[2].mxu0  ;;  %v3368_v18 = vmov 0.0   ;;  %v1705_v22 = vrot.slane %v3536_v16, %v1704_v21 }
  0xf1   : > { %v782_v25 = vmax.f32 %v780_v23, 0.0  ;;  %v1036_v33 = vpop.f32.mrb[3].mxu0  ;;  %v1042_v43 = vadd.f32 %v3045_v32, %v966_v39  ;;  %v1401_v23 = vsub.s32 4, %v3499_v3 }
  0xf2   : > { %v781_v26 = vmax.f32 %v779_v24, 0.0  ;;  %v1037_v45 = vadd.f32 %v1036_v33, %v966_v39  ;;  %1707 = vrot.lane.b32.xlu1 %v1705_v22, %s3369_s0  ;;  %v1591_v39 = vld [vmem:[%s3815_s14] sm:$0xff] }
  0xf3   : > { %v784_v27 = vrot.slane %v782_v25, 7  ;;  %v1402_v24 = vrot.slane %v3536_v16, %v1401_v23 }
  0xf4   : > { %v783_v28 = vrot.slane %v781_v26, 7  ;;  %3033 = vmatprep.mubr.msk.f32.mxu1 %vm791_vm3, %v781_v26 }
  0xf5   : > { %3034 = vmatmul.mubr.msk.f32.vlgmr.msra.gmra.mrb[2].mxu1 %vm791_vm3, %v782_v25 }
  0xf6   : > { %3037 = vmatpush3.msra.mxu1 %v789_v12  ;;  %v786_v29 = vsel %vm596_vm2, %v784_v27, %v783_v28  ;;  %v785_v30 = vsel %vm596_vm2, %v783_v28, %v784_v27  ;;  %v3168_v12 = vpack.c.bf16 %v1495_v11, %v1494_v10 }
  0xf7   : > { %v787_v31 = vsel %vm596_vm2, 0.0, %v786_v29  ;;  %3046 = vmatprep.subr.mxu1 %v1058_v34 }
  0xf8   : > { %3038 = vmatprep.mubr.msk.f32.mxu1 %vm791_vm3, %v787_v31 }
  0xfd   : > { %3039 = vmatmul.mubr.msk.f32.vlgmr.msra.gmra.mrb[2].mxu1 %vm791_vm3, %v785_v30 }
  0xfe   : > { %3047 = vmatpush3.msra.mxu1 %v1058_v34 }
  0xff   : > { %3051 = vmatprep.subr.mxu1 %v1057_v35 }
 0x1d0   : > { %v3040_v40 = vpop.f32.mrb[2].mxu1 }
 0x1d1   : > { %v959_v41 = vadd.f32 %v3040_v40, %v957_v38  ;;  %v945_v42 = vpop.f32.mrb[3].mxu1  ;;  %v1592_v40 = vld [vmem:[%s3815_s14 + $0x8] sm:$0xff] }
 0x1d2   : > { %v958_v44 = vadd.f32 %v957_v38, %v945_v42  ;;  %v1593_v42 = vld [vmem:[%s3815_s14 + $0x10] sm:$0xff] }
 0x1d3   : > { %v961_v46 = vmax.f32 %v959_v41, 0.0  ;;  %v3173_v41 = vpack.c.bf16 %v1592_v40, %v1591_v39 }
 0x1d4   : > { %v960_v47 = vmax.f32 %v958_v44, 0.0 }
 0x1d5   : > { %v1046_v48 = vadd.f32 %v1042_v43, %v961_v46  ;;  %v1594_v43 = vld [vmem:[%s3815_s14 + $0x18] sm:$0xff] }
 0x1d6   : > { %v1045_v49 = vadd.f32 %v1037_v45, %v960_v47  ;;  %v3177_v44 = vpack.c.bf16 %v1594_v43, %v1593_v42  ;;  %v1499_v45 = vrot.slane %v3536_v16, 5  ;;  %v589_v43 = vld [vmem:[%s3825_s1 + $0x8] sm:$0x7] }
 0x1d7   : > { %v3564_v50 = vmax.f32 %v1046_v48, 0.0 }
 0x1d8   : > { %v3566_v51 = vmax.f32 %v1045_v49, 0.0 }
 0x1d9   : > { %v1050_v52 = vrot.slane %v3564_v50, 6 }
 0x1da   : > { %v1049_v53 = vrot.slane %v3566_v51, 6  ;;  %3048 = vmatprep.mubr.msk.f32.mxu1 %vm791_vm3, %v3566_v51 }
 0x1db   : > { %3049 = vmatmul.mubr.msk.f32.vlgmr.msra.gmra.mrb[4].mxu1 %vm791_vm3, %v3564_v50 }
 0x1dc   : > { %3052 = vmatpush3.msra.mxu1 %v1057_v35  ;;  %v1053_v54 = vsel %vm1051_vm4, %v1050_v52, %v1049_v53  ;;  %v1052_v56 = vsel %vm1051_vm4, %v1049_v53, %v1050_v52 }
 0x1dd   : > { %v1055_v55 = vsel %vm1051_vm4, 0.0, %v1053_v54  ;;  %3066 = vmatprep.subr.mxu1 %v1412_v20 }
 0x1de   : > { %3053 = vmatprep.mubr.msk.f32.mxu1 %vm791_vm3, %v1055_v55 }
 0x1e3   : > { %3054 = vmatmul.mubr.msk.f32.vlgmr.msra.gmra.mrb[4].mxu1 %vm791_vm3, %v1052_v56 }
 0x1e4   : > { %3067 = vmatpush3.msra.mxu1 %v1412_v20 }
 0x1e5   : > { %3174 = vmatprep.subr.bf16.mxu1 %v3173_v41 }
 0x2b6   : > { %v3055_v61 = vpop.f32.mrb[4].mxu1 }
 0x2b7   : > { %v1226_v62 = vadd.f32 %v3055_v61, %v1224_v60  ;;  %v1212_v63 = vpop.f32.mrb[5].mxu1 }
 0x2b8   : > { %v1225_v0 = vadd.f32 %v1224_v60, %v1212_v63  ;;  %v1597_v60 = vsub.s32 7, %v3499_v3 }
 0x2b9   : > { %v1228_v1 = vmax.f32 %v1226_v62, 0.0 }
 0x2ba   : > { %v1227_v2 = vmax.f32 %v1225_v0, 0.0  ;;  %v1598_v61 = vrot.slane %v3536_v16, %v1597_v60 }
 0x2bb   : > { %v1230_v4 = vrot.slane %v1228_v1, 6 }
 0x2bc   : > { %v1229_v5 = vrot.slane %v1227_v2, 6  ;;  %3058 = vmatprep.mubr.msk.f32.mxu0 %vm791_vm3, %v1227_v2 }
 0x2bd   : > { %3059 = vmatmul.mubr.msk.f32.vlgmr.msra.gmra.mrb[4].mxu0 %vm791_vm3, %v1228_v1 }
 0x2be   : > { %3062 = vmatpush3.msra.mxu0 %v1235_v58  ;;  %v1232_v6 = vsel %vm1051_vm4, %v1230_v4, %v1229_v5  ;;  %v1231_v7 = vsel %vm1051_vm4, %v1229_v5, %v1230_v4 }
 0x2bf   : > { %v1233_v8 = vsel %vm1051_vm4, 0.0, %v1232_v6  ;;  %3167 = vmatprep.subr.bf16.mxu0 %v3366_v9 }
 0x2c0   : > { %3063 = vmatprep.mubr.msk.f32.mxu0 %vm791_vm3, %v1233_v8 }
 0x2c5   : > { %3064 = vmatmul.mubr.msk.f32.vlgmr.msra.gmra.mrb[4].mxu0 %vm791_vm3, %v1231_v7 }
 0x2c6   : > { %3169 = vmatpush3.bf16.msra.mxu0 %v3168_v12  ;;  %3079 = vmatprep.mubr.msk.f32.mxu0 %vm3367_vm5, %v3368_v18 }
 0x2c7   : > { %3170 = vmatprep.subr.bf16.mxu0 %v3366_v9 }
 0x2ca   : > { %3172 = vmatpush3.bf16.msra.mxu0 %v3171_v17  ;;  %v1708_v17 = vpop.permute.xlu1 %1707 }
 0x2cd   : > { %3080 = vmatmul.mubr.msk.f32.vlgmr.msra.gmra.mrb[6].mxu0 %vm1501_vm6, %v1411_v19 }
 0x398   : > { %v3065_v25 = vpop.f32.mrb[4].mxu0 }
 0x399   : > { %v1404_v26 = vadd.f32 %v3065_v25, %v1402_v24  ;;  %v1390_v27 = vpop.f32.mrb[5].mxu0 }
 0x39a   : > { %v1403_v28 = vadd.f32 %v1402_v24, %v1390_v27 }
 0x39b   : > { %v1406_v29 = vmax.f32 %v1404_v26, 0.0 }
 0x39c   : > { %v1405_v30 = vmax.f32 %v1403_v28, 0.0 }
 0x39d   : > { %v1408_v31 = vadd.f32 %v1406_v29, %v3564_v50 }
 0x39e   : > { %v1407_v32 = vadd.f32 %v1405_v30, %v3566_v51 }
 0x39f   : > { %v1410_v34 = vmax.f32 %v1408_v31, 0.0 }
 0x3a0   : > { %v1409_v33 = vmax.f32 %v1407_v32, 0.0  ;;  %v1571_v35 = vpop.f32.mrb[6].mxu0 }
 0x3a1   : > { %v3081_v38 = vpop.f32.mrb[7].mxu0  ;;  %v1572_v46 = vadd.f32 %v1571_v35, %v1499_v45  ;;  %v1768_v45 = vrot.slane %v589_v43, %v3531_v14 }
 0x3a2   : > { %3068 = vmatprep.mubr.msk.f32.mxu1 %vm791_vm3, %v1409_v33 }
 0x3a3   : > { %3069 = vmatmul.mubr.msk.f32.vlgmr.msra.gmra.mrb[6].mxu1 %vm791_vm3, %v1410_v34  ;;  %v1578_v47 = vrot.slane %v1572_v46, %v3531_v14  ;;  %v1785_v46 = vld [vmem:[%s3816_s15] sm:$0xff]  ;;  %v1787_v14 = vld [vmem:[%s3816_s15 + $0x10] sm:$0xff] }
 0x3a4   : > { %3176 = vmatpush3.bf16.msra.mxu1 %v3173_v41 }
 0x3a5   : > { %3178 = vmatprep.subr.bf16.mxu1 %v3177_v44 }
 0x3a8   : > { %3180 = vmatpush3.bf16.msra.mxu1 %v3177_v44  ;;  %v1778_v44 = vrot.slane %v589_v43, %v956_v36 }
 0x476   : > { %v3070_v48 = vpop.f32.mrb[6].mxu1 }
 0x477   : > { %v1580_v49 = vadd.f32 %v3070_v48, %v1578_v47  ;;  %v1485_v50 = vpop.f32.mrb[7].mxu1  ;;  %v1711_v22 = vadd.f32 %v3070_v48, %v1708_v17 }
 0x478   : > { %v1579_v51 = vadd.f32 %v1578_v47, %v1485_v50  ;;  %v1710_v19 = vadd.f32 %v1708_v17, %v1485_v50  ;;  %v1786_v47 = vld [vmem:[%s3816_s15 + $0x8] sm:$0xff] }
 0x479   : > { %v1585_v52 = vmul.f32 1.442695, %v1580_v49  ;;  %vm1582_vm8 = vcmp.gt.f32.partialorder %v1580_v49, 0.0  ;;  %v3181_v48 = vpack.c.bf16 %v1786_v47, %v1785_v46 }
 0x47a   : > { %v1583_v53 = vmul.f32 1.442695, %v1579_v51  ;;  %vm1581_vm7 = vcmp.gt.f32.partialorder %v1579_v51, 0.0 }
 0x47b   : > { %3310 = vpow2.f32 %v1585_v52  ;;  %3182 = vmatprep.subr.bf16.mxu0 %v3181_v48 }
 0x47c   : > { %3312 = vpow2.f32 %v1583_v53  ;;  %3184 = vmatpush3.bf16.msra.mxu0 %v3181_v48  ;;  %v1788_v53 = vld [vmem:[%s3816_s15 + $0x18] sm:$0xff] }
 0x485   : > { %v3311_v54 = vpop.eup %3310 }
 0x486   : > { %v3313_v55 = vpop.eup %3312  ;;  %v2902_v56 = vadd.f32 -1.0, %v3311_v54 }
 0x487   : > { %v2901_v57 = vadd.f32 -1.0, %v3313_v55  ;;  %v3185_v55 = vpack.c.bf16 %v1788_v53, %v1787_v14 }
 0x488   : > { %v1590_v59 = vsel %vm1582_vm8, %v1580_v49, %v2902_v56 }
 0x489   : > { %v1589_v58 = vsel %vm1581_vm7, %v1579_v51, %v2901_v57  ;;  %3186 = vmatprep.subr.bf16.mxu0 %v3185_v55 }
 0x48a   : > { %3090 = vmatprep.mubr.msk.f32.mxu1 %vm1501_vm6, %v1589_v58  ;;  %3188 = vmatpush3.bf16.msra.mxu0 %v3185_v55 }
 0x48b   : > { %3091 = vmatmul.mubr.msk.f32.vlgmr.msra.gmra.mrb[8].mxu1 %vm1501_vm6, %v1590_v59 }
 0x55e   : > { %v3092_v62 = vpop.f32.mrb[8].mxu1 }
 0x55f   : > { %v1677_v63 = vadd.f32 %v3092_v62, %v1598_v61  ;;  %v1671_v0 = vpop.f32.mrb[9].mxu1 }
 0x560   : > { %v1672_v1 = vadd.f32 %v1671_v0, %v1598_v61 }
 0x561   : > { %v2906_v2 = vmul.f32 -1.442695, %v1677_v63 }
 0x562   : > { %v2905_v4 = vmul.f32 -1.442695, %v1672_v1 }
 0x563   : > { %3314 = vpow2.f32 %v2906_v2 }
 0x564   : > { %3316 = vpow2.f32 %v2905_v4 }
 0x56d   : > { %v3315_v5 = vpop.eup %3314 }
 0x56e   : > { %v3317_v6 = vpop.eup %3316  ;;  %v1687_v8 = vadd.f32 1.0, %v3315_v5  ;;  %v1792_v5 = vrot.slane %v589_v43, %v965_v37 }
 0x56f   : > { %v1686_v7 = vadd.f32 1.0, %v3317_v6 }
 0x571   : > { %3318 = vrcp.f32 %v1686_v7 }
 0x572   : > { %3320 = vrcp.f32 %v1687_v8 }
 0x57b   : > { %v3319_v10 = vpop.eup %3318 }
 0x57c   : > { %1694 = vrot.lane.b32.xlu0 %v3319_v10, %s3370_s26  ;;  %v3321_v11 = vpop.eup %3320 }
 0x580   : > { %1696 = vrot.lane.b32.xlu0 %v3321_v11, %s3370_s26 }
 0x5ee   : > { %v1695_v16 = vpop.permute.xlu0 %1694 }
 0x5ef   : > { %v1700_v12 = vmul.f32 %v1695_v16, %v1672_v1 }
 0x5f1   : > { %1714 = vrot.lane.b32.xlu1 %v1700_v12, %s3369_s0 }
 0x5f2   : > { %v1697_v13 = vpop.permute.xlu0 %1696 }
 0x5f3   : > { %v1701_v15 = vmul.f32 %v1697_v13, %v1677_v63 }
 0x5f5   : > { %1716 = vrot.lane.b32.xlu0 %v1701_v15, %s3369_s0 }
 0x663   : > { %v1715_v20 = vpop.permute.xlu1 %1714 }
 0x664   : > { %v1720_v21 = vadd.f32 %v1715_v20, %v1710_v19 }
 0x666   : > { %1724 = vrot.lane.b32.xlu1 %v1720_v21, %s3370_s26 }
 0x667   : > { %v1717_v23 = vpop.permute.xlu0 %1716 }
 0x668   : > { %v1721_v24 = vadd.f32 %v1717_v23, %v1711_v22 }
 0x66a   : > { %1726 = vrot.lane.b32.xlu0 %v1721_v24, %s3370_s26 }
 0x6d8   : > { %v1725_v25 = vpop.permute.xlu1 %1724 }
 0x6d9   : > { %v1730_v26 = vsel %vm1501_vm6, %v1725_v25, 0.0 }
 0x6da   : > { %1731 = vadd.xlane.f32.xlu1 %v1730_v26 }
 0x6dc   : > { %v1727_v27 = vpop.permute.xlu0 %1726 }
 0x6dd   : > { %v1733_v28 = vsel %vm1501_vm6, %v1727_v27, 0.0 }
 0x6de   : > { %1734 = vadd.xlane.f32.xlu0 %v1733_v28 }
 0x767   : > { %v1732_v29 = vpop.xlane.xlu1 %1731 }
 0x768   : > { %v1737_v30 = vmul.f32 0.03125, %v1732_v29 }
 0x76a   : > { %v1739_v31 = vsub.f32 %v1720_v21, %v1737_v30 }
 0x76b   : > { %v1735_v32 = vpop.xlane.xlu0 %1734 }
 0x76c   : > { %v1738_v33 = vmul.f32 0.03125, %v1735_v32  ;;  %v1741_v34 = vmul.f32 %v1739_v31, %v1739_v31 }
 0x76e   : > { %v1740_v35 = vsub.f32 %v1721_v24, %v1738_v33  ;;  %1745 = vrot.lane.b32.xlu0 %v1741_v34, %s3370_s26 }
 0x770   : > { %v1742_v38 = vmul.f32 %v1740_v35, %v1740_v35 }
 0x772   : > { %1747 = vrot.lane.b32.xlu1 %v1742_v38, %s3370_s26 }
 0x7e0   : > { %v1746_v39 = vpop.permute.xlu0 %1745 }
 0x7e1   : > { %v1751_v40 = vsel %vm1501_vm6, %v1746_v39, 0.0 }
 0x7e2   : > { %1752 = vadd.xlane.f32.xlu1 %v1751_v40 }
 0x7e4   : > { %v1748_v41 = vpop.permute.xlu1 %1747 }
 0x7e5   : > { %v1754_v42 = vsel %vm1501_vm6, %v1748_v41, 0.0 }
 0x7e6   : > { %1755 = vadd.xlane.f32.xlu0 %v1754_v42 }
 0x7f3   : > { %1780 = vrot.lane.b32.xlu1 %v1778_v44, %s3369_s0 }
 0x7fc   : > { %1770 = vrot.lane.b32.xlu0 %v1768_v45, %s3369_s0  ;;  %s3381_s0 = smov 8  }
 0x86f   : > { %v1753_v49 = vpop.xlane.xlu1 %1752 }
 0x870   : > { %v1757_v50 = vmul.f32 0.03125, %v1753_v49 }
 0x872   : > { %v1759_v36 = vadd.f32 1e-05, %v1757_v50 }
 0x873   : > { %v1756_v51 = vpop.xlane.xlu0 %1755  ;;  %v1781_v59 = vpop.permute.xlu1 %1780 }
 0x874   : > { %3322 = vrsqrt.f32 %v1759_v36  ;;  %v1758_v52 = vmul.f32 0.03125, %v1756_v51 }
 0x876   : > { %v1760_v54 = vadd.f32 1e-05, %v1758_v52 }
 0x877   : > { %v1771_v57 = vpop.permute.xlu0 %1770 }
 0x878   : > { %3324 = vrsqrt.f32 %v1760_v54 }
 0x87e   : > { %v3323_v56 = vpop.eup %3322 }
 0x87f   : > { %v1763_v58 = vmul.f32 %v3323_v56, %v1739_v31 }
 0x881   : > { %v1773_v60 = vmul.f32 %v1771_v57, %v1763_v58 }
 0x882   : > { %v3325_v61 = vpop.eup %3324 }
 0x883   : > { %v1764_v62 = vmul.f32 %v3325_v61, %v1740_v35  ;;  %v1783_v63 = vadd.f32 %v1781_v59, %v1773_v60 }
 0x885   : > { %v1774_v0 = vmul.f32 %v1771_v57, %v1764_v62  ;;  %1795 = vrot.lane.b32.xlu1 %v1783_v63, %s3370_s26 }
 0x887   : > { %v1784_v1 = vadd.f32 %v1781_v59, %v1774_v0 }
 0x889   : > { %1797 = vrot.lane.b32.xlu0 %v1784_v1, %s3370_s26 }
 0x8f7   : > { %v1796_v2 = vpop.permute.xlu1 %1795 }
 0x8f8   : > { %3101 = vmatprep.mubr.msk.f32.mxu0 %vm1501_vm6, %v1796_v2 }
 0x8fb   : > { %v1798_v4 = vpop.permute.xlu0 %1797 }
 0x8fc   : > { %3102 = vmatmul.mubr.msk.f32.vlgmr.msra.gmra.mrb[8].mxu0 %vm1501_vm6, %v1798_v4 }
 0x9cf   : > { %v3103_v6 = vpop.f32.mrb[8].mxu0 }
 0x9d0   : > { %v3690_v7 = vadd.f32 %v3103_v6, %v1792_v5  ;;  %v1869_v8 = vpop.f32.mrb[9].mxu0 }
 0x9d1   : > { %v3692_v10 = vadd.f32 %v1869_v8, %v1792_v5 }
 0x9d3   : > { %3108 = vmatprep.mubr.msk.f32.mxu1 %vm791_vm3, %v3692_v10  ;;  %v3698_v11 = vpack.i.bf16 %v3690_v7, %v3692_v10 }
 0x9d5   : > { %3274 = vrot.lane.b32.xlu0 %v3698_v11, %s3371_s25  ;;  %3269 = vrot.lane.b32.xlu1 %v3698_v11, %s3370_s26  ;;  %s3373_s26 = smov 56   ;;  %s3383_s25 = smov 24  }
 0x9d9   : > { %2081 = vrot.lane.b32.xlu0 %v3690_v7, %s3372_s29  ;;  %2079 = vrot.lane.b32.xlu1 %v3692_v10, %s3372_s29 }
 0xa47   : > { %v3275_v37 = vpop.permute.xlu0 %3274  ;;  %v3270_v16 = vpop.permute.xlu1 %3269 }
 0xa48   : > { %v3277_v12 = vunpack.i.h.bf16 %v3275_v37  ;;  %v3276_v13 = vunpack.i.l.bf16 %v3275_v37  ;;  %v3272_v15 = vunpack.i.h.bf16 %v3270_v16  ;;  %v3271_v17 = vunpack.i.l.bf16 %v3270_v16 }
 0xa4a   : > { %v3189_v20 = vpack.c.bf16 %v3272_v15, %v3271_v17  ;;  %v3199_v21 = vpack.c.bf16 %v3277_v12, %v3276_v13 }
 0xa4b   : > { %v2080_v22 = vpop.permute.xlu1 %2079  ;;  %v2082_v23 = vpop.permute.xlu0 %2081 }
 0xa4c   : > { %3191 = vmatprep.subr.msk.bf16.mxu1 %vm3707_vm9, %v3189_v20 }
 0xa4d   : > { %3194 = vmatpush3.bf16.xpose.msk.msra.mxu1 %vm3707_vm9, %v3189_v20 }
 0xa4e   : > { %3201 = vmatprep.subr.msk.bf16.mxu1 %vm3707_vm9, %v3199_v21 }
 0xa54   : > { %3109 = vmatmul.mubr.msk.f32.vlgmr.msra.gmra.mrb[10].mxu1 %vm791_vm3, %v3690_v7 }
 0xa55   : > { %3204 = vmatpush3.bf16.xpose.msk.msra.mxu1 %vm3707_vm9, %v3199_v21  ;;  %3122 = vmatprep.mubr.msk.f32.mxu1 %vm791_vm3, %v2080_v22 }
 0xa5c   : > { %3123 = vmatmul.mubr.msk.f32.vlgmr.msra.gmra.mrb[12].mxu1 %vm791_vm3, %v2082_v23 }
 0xb27   : > { %v3110_v24 = vpop.f32.mrb[10].mxu1 }
 0xb28   : > { %v1958_v25 = vpop.f32.mrb[11].mxu1  ;;  %v1971_v26 = vsel %vm1967_vm10, %v3110_v24, -inf }
 0xb29   : > { %1972 = vmax.xlane.f32.xlu0 %v1971_v26  ;;  %v1968_v27 = vsel %vm1967_vm10, %v1958_v25, -inf }
 0xb2a   : > { %1969 = vmax.xlane.f32.xlu1 %v1968_v27 }
 0xb2f   : > { %v3124_v28 = vpop.f32.mrb[12].mxu1 }
 0xb30   : > { %v2161_v29 = vpop.f32.mrb[13].mxu1  ;;  %v2173_v30 = vsel %vm1967_vm10, %v3124_v28, -inf }
 0xb31   : > { %2174 = vmax.xlane.f32.xlu1 %v2173_v30  ;;  %v2170_v31 = vsel %vm1967_vm10, %v2161_v29, -inf }
 0xb32   : > { %2171 = vmax.xlane.f32.xlu0 %v2170_v31 }
 0xbb6   : > { %v1973_v32 = vpop.xlane.xlu0 %1972 }
 0xbb7   : > { %v1975_v33 = vsub.f32 %v3110_v24, %v1973_v32  ;;  %v1970_v34 = vpop.xlane.xlu1 %1969 }
 0xbb8   : > { %v1974_v35 = vsub.f32 %v1958_v25, %v1970_v34 }
 0xbb9   : > { %v1978_v38 = vmul.f32 1.442695, %v1975_v33 }
 0xbba   : > { %v1976_v39 = vmul.f32 1.442695, %v1974_v35 }
 0xbbb   : > { %3326 = vpow2.f32 %v1978_v38 }
 0xbbc   : > { %3328 = vpow2.f32 %v1976_v39 }
 0xbbe   : > { %v2175_v40 = vpop.xlane.xlu1 %2174 }
 0xbbf   : > { %v2177_v41 = vsub.f32 %v3124_v28, %v2175_v40  ;;  %v2172_v42 = vpop.xlane.xlu0 %2171 }
 0xbc0   : > { %v2176_v43 = vsub.f32 %v2161_v29, %v2172_v42 }
 0xbc1   : > { %v2180_v44 = vmul.f32 1.442695, %v2177_v41 }
 0xbc2   : > { %v2178_v45 = vmul.f32 1.442695, %v2176_v43 }
 0xbc3   : > { %3330 = vpow2.f32 %v2180_v44 }
 0xbc4   : > { %3332 = vpow2.f32 %v2178_v45 }
 0xbc5   : > { %v3327_v46 = vpop.eup %3326 }
 0xbc6   : > { %v3329_v47 = vpop.eup %3328  ;;  %v1983_v48 = vsel %vm1967_vm10, %v3327_v46, 0.0 }
 0xbc7   : > { %1984 = vadd.xlane.f32.xlu1 %v1983_v48  ;;  %v1980_v49 = vsel %vm1967_vm10, %v3329_v47, 0.0 }
 0xbc8   : > { %1981 = vadd.xlane.f32.xlu0 %v1980_v49 }
 0xbcd   : > { %v3331_v50 = vpop.eup %3330 }
 0xbce   : > { %v3333_v36 = vpop.eup %3332  ;;  %v2185_v51 = vsel %vm1967_vm10, %v3331_v50, 0.0 }
 0xbcf   : > { %2186 = vadd.xlane.f32.xlu1 %v2185_v51  ;;  %v2182_v52 = vsel %vm1967_vm10, %v3333_v36, 0.0 }
 0xbd0   : > { %2183 = vadd.xlane.f32.xlu0 %v2182_v52 }
 0xbe0   : > { %3284 = vrot.lane.b32.xlu1 %v3698_v11, %s3373_s26 }
 0xbe4   : > { %3289 = vrot.lane.b32.xlu1 %v3698_v11, %s3374_s30 }
 0xbe6   : > { %3279 = vrot.lane.b32.xlu0 %v3698_v11, %s3375_s19 }
 0xbe8   : > { %2292 = vrot.lane.b32.xlu1 %v3690_v7, %s3376_s20 }
 0xbea   : > { %2290 = vrot.lane.b32.xlu0 %v3692_v10, %s3376_s20  ;;  %s2876_s20 = sshll.u32 %s3830_s28, 2 }
 0xc54   : > { %v1985_v53 = vpop.xlane.xlu1 %1984 }
 0xc55   : > { %v1982_v14 = vpop.xlane.xlu0 %1981 }
 0xc56   : > { %3334 = vrcp.f32 %v1982_v14 }
 0xc57   : > { %3336 = vrcp.f32 %v1985_v53 }
 0xc5c   : > { %v2187_v54 = vpop.xlane.xlu1 %2186 }
 0xc5d   : > { %v2184_v55 = vpop.xlane.xlu0 %2183 }
 0xc5e   : > { %3338 = vrcp.f32 %v2184_v55 }
 0xc5f   : > { %3340 = vrcp.f32 %v2187_v54 }
 0xc60   : > { %v3335_v56 = vpop.eup %3334  ;;  %v3285_v57 = vpop.permute.xlu1 %3284 }
 0xc61   : > { %v3280_v58 = vpop.permute.xlu0 %3279  ;;  %v1987_v59 = vmul.f32 %v3335_v56, %v3329_v47  ;;  %v3287_v60 = vunpack.i.h.bf16 %v3285_v57  ;;  %v3286_v61 = vunpack.i.l.bf16 %v3285_v57  ;;  %v3337_v2 = vpop.eup %3336 }
 0xc62   : > { %v3282_v62 = vunpack.i.h.bf16 %v3280_v58  ;;  %v3281_v63 = vunpack.i.l.bf16 %v3280_v58  ;;  %v1989_v37 = vmul.f32 %v3337_v2, %v3327_v46 }
 0xc63   : > { %3115 = vmatprep.mubr.msk.f32.mxu0 %vm1967_vm10, %v1987_v59  ;;  %v3205_v4 = vpack.c.bf16 %v3287_v60, %v3286_v61 }
 0xc64   : > { %v3195_v0 = vpack.c.bf16 %v3282_v62, %v3281_v63  ;;  %v3290_v1 = vpop.permute.xlu1 %3289 }
 0xc65   : > { %v3292_v5 = vunpack.i.h.bf16 %v3290_v1  ;;  %v3291_v6 = vunpack.i.l.bf16 %v3290_v1  ;;  %v2291_v17 = vpop.permute.xlu0 %2290 }
 0xc66   : > { %3196 = vmatprep.subr.bf16.mxu0 %v3195_v0 }
 0xc67   : > { %3198 = vmatpush3.bf16.msra.mxu0 %v3195_v0  ;;  %v3209_v13 = vpack.c.bf16 %v3292_v5, %v3291_v6 }
 0xc68   : > { %v3339_v8 = vpop.eup %3338  ;;  %3206 = vmatprep.subr.bf16.mxu0 %v3205_v4  ;;  %v2293_v20 = vpop.permute.xlu1 %2292 }
 0xc69   : > { %v3341_v16 = vpop.eup %3340  ;;  %v2189_v12 = vmul.f32 %v3339_v8, %v3333_v36 }
 0xc6a   : > { %3116 = vmatmul.mubr.msk.f32.vlgmr.msra.gmra.mrb[10].mxu0 %vm1967_vm10, %v1989_v37  ;;  %v2191_v15 = vmul.f32 %v3341_v16, %v3331_v50 }
 0xc6b   : > { %3208 = vmatpush3.bf16.msra.mxu0 %v3205_v4  ;;  %3129 = vmatprep.mubr.msk.f32.mxu0 %vm1967_vm10, %v2189_v12 }
 0xc6c   : > { %3211 = vmatprep.subr.msk.bf16.mxu0 %vm3707_vm9, %v3209_v13 }
 0xc6e   : > { %3130 = vmatmul.mubr.msk.f32.vlgmr.msra.gmra.mrb[12].mxu0 %vm1967_vm10, %v2191_v15 }
 0xc6f   : > { %3136 = vmatprep.mubr.msk.f32.mxu0 %vm791_vm3, %v2291_v17 }
 0xc74   : > { %3214 = vmatpush3.bf16.xpose.msk.msra.mxu0 %vm3707_vm9, %v3209_v13 }
 0xc7b   : > { %3137 = vmatmul.mubr.msk.f32.vlgmr.msra.gmra.mrb[14].mxu0 %vm791_vm3, %v2293_v20 }
 0xd3d   : > { %v3117_v21 = vpop.f32.mrb[10].mxu0 }
 0xd3e   : > { %2078 = vst.msk [vmem:[#allocation2 + $0x8] sm:$0xff] %vm791_vm3, %v3117_v21  ;;  %v2068_v22 = vpop.f32.mrb[11].mxu0 }
 0xd3f   : > { %2077 = vst.msk [vmem:[#allocation2] sm:$0xff] %vm791_vm3, %v2068_v22 }
 0xd41   : > { %v3748_v23 = vpop.f32.mrb[12].mxu0 }
 0xd42   : > { %v3750_v24 = vpop.f32.mrb[13].mxu0 }
 0xd4e   : > { %v3138_v25 = vpop.f32.mrb[14].mxu0 }
 0xd4f   : > { %v2372_v26 = vpop.f32.mrb[15].mxu0  ;;  %v2384_v27 = vsel %vm1967_vm10, %v3138_v25, -inf }
 0xd50   : > { %2385 = vmax.xlane.f32.xlu1 %v2384_v27  ;;  %v2381_v28 = vsel %vm1967_vm10, %v2372_v26, -inf }
 0xd51   : > { %2382 = vmax.xlane.f32.xlu0 %v2381_v28 }
 0xd61   : > { %3294 = vrot.lane.b32.xlu1 %v3698_v11, %s3377_s21 }
 0xd65   : > { %2501 = vrot.lane.b32.xlu1 %v3692_v10, %s3378_s22 }
 0xd69   : > { %2503 = vrot.lane.b32.xlu1 %v3690_v7, %s3378_s22 }
 0xddd   : > { %v2386_v29 = vpop.xlane.xlu1 %2385 }
 0xdde   : > { %v2388_v30 = vsub.f32 %v3138_v25, %v2386_v29  ;;  %v2383_v31 = vpop.xlane.xlu0 %2382  ;;  %v2715_v25 = vld [vmem:[%s3818_s17] sm:$0x7] }
 0xddf   : > { %v2387_v32 = vsub.f32 %v2372_v26, %v2383_v31  ;;  %v3384_v26 = vmov 0   ;;  %v2714_v31 = vld [vmem:[%s3817_s16] sm:$0x7] }
 0xde0   : > { %v2391_v33 = vmul.f32 1.442695, %v2388_v30  ;;  %3308 = vset.pattern.permute.xlu1 %v3384_v26  ;;  %3309 = vset.pattern.permute.xlu0 %v3384_v26 }
 0xde1   : > { %v2389_v34 = vmul.f32 1.442695, %v2387_v32  ;;  %v3295_v35 = vpop.permute.xlu1 %3294 }
 0xde2   : > { %3342 = vpow2.f32 %v2391_v33  ;;  %v3297_v38 = vunpack.i.h.bf16 %v3295_v35  ;;  %v3296_v39 = vunpack.i.l.bf16 %v3295_v35 }
 0xde3   : > { %3344 = vpow2.f32 %v2389_v34 }
 0xde4   : > { %v3215_v40 = vpack.c.bf16 %v3297_v38, %v3296_v39 }
 0xde5   : > { %v2502_v52 = vpop.permute.xlu1 %2501 }
 0xde6   : > { %3216 = vmatprep.subr.bf16.mxu1 %v3215_v40 }
 0xde7   : > { %3218 = vmatpush3.bf16.msra.mxu1 %v3215_v40 }
 0xde9   : > { %v2504_v14 = vpop.permute.xlu1 %2503 }
 0xdec   : > { %v3343_v41 = vpop.eup %3342 }
 0xded   : > { %v2396_v42 = vsel %vm1967_vm10, %v3343_v41, 0.0  ;;  %v3345_v10 = vpop.eup %3344 }
 0xdee   : > { %2397 = vadd.xlane.f32.xlu0 %v2396_v42  ;;  %v2393_v7 = vsel %vm1967_vm10, %v3345_v10, 0.0 }
 0xdf2   : > { %2394 = vadd.xlane.f32.xlu0 %v2393_v7 }
 0xe08   : > { %3299 = vrot.lane.b32.xlu0 %v3698_v11, %s3379_s2  ;;  %s587_s2 = scalar_lea.vmem %s3819_s18, %s2876_s20 }
 0xe7b   : > { %v2398_v43 = vpop.xlane.xlu0 %2397 }
 0xe7c   : > { %3346 = vrcp.f32 %v2398_v43 }
 0xe7f   : > { %v2395_v44 = vpop.xlane.xlu0 %2394 }
 0xe80   : > { %3348 = vrcp.f32 %v2395_v44 }
 0xe83   : > { %v3300_v45 = vpop.permute.xlu0 %3299 }
 0xe84   : > { %v3302_v46 = vunpack.i.h.bf16 %v3300_v45  ;;  %v3301_v47 = vunpack.i.l.bf16 %v3300_v45 }
 0xe86   : > { %v3219_v48 = vpack.c.bf16 %v3302_v46, %v3301_v47  ;;  %v3347_v49 = vpop.eup %3346 }
 0xe87   : > { %v2402_v51 = vmul.f32 %v3347_v49, %v3343_v41 }
 0xe88   : > { %3221 = vmatprep.subr.msk.bf16.mxu1 %vm3707_vm9, %v3219_v48 }
 0xe8a   : > { %v3349_v50 = vpop.eup %3348 }
 0xe8b   : > { %v2400_v36 = vmul.f32 %v3349_v50, %v3345_v10 }
 0xe8d   : > { %3143 = vmatprep.mubr.msk.f32.mxu1 %vm1967_vm10, %v2400_v36 }
 0xe8e   : > { %3144 = vmatmul.mubr.msk.f32.vlgmr.msra.gmra.mrb[14].mxu1 %vm1967_vm10, %v2402_v51 }
 0xe8f   : > { %3224 = vmatpush3.bf16.xpose.msk.msra.mxu1 %vm3707_vm9, %v3219_v48  ;;  %3150 = vmatprep.mubr.msk.f32.mxu1 %vm791_vm3, %v2502_v52 }
 0xe96   : > { %3151 = vmatmul.mubr.msk.f32.vlgmr.msra.gmra.mrb[16].mxu1 %vm791_vm3, %v2504_v14 }
 0xf61   : > { %v3145_v53 = vpop.f32.mrb[14].mxu1 }
 0xf62   : > { %v2481_v54 = vpop.f32.mrb[15].mxu1 }
 0xf69   : > { %v3152_v55 = vpop.f32.mrb[16].mxu1 }
 0xf6a   : > { %v2583_v56 = vpop.f32.mrb[17].mxu1  ;;  %v2595_v57 = vsel %vm1967_vm10, %v3152_v55, -inf }
 0xf6b   : > { %2596 = vmax.xlane.f32.xlu1 %v2595_v57  ;;  %v2592_v58 = vsel %vm1967_vm10, %v2583_v56, -inf }
 0xf6c   : > { %2593 = vmax.xlane.f32.xlu0 %v2592_v58 }
 0xf7c   : > { %3304 = vrot.lane.b32.xlu1 %v3698_v11, %s3380_s23 }
 0xf80   : > { %2283 = vrot.lane.b32.xlu1 %v3748_v23, %s3381_s0 }
 0xf84   : > { %2492 = vrot.lane.b32.xlu1 %v2481_v54, %s3382_s24 }
 0xff8   : > { %v2597_v19 = vpop.xlane.xlu1 %2596 }
 0xff9   : > { %v2599_v59 = vsub.f32 %v3152_v55, %v2597_v19  ;;  %v2594_v60 = vpop.xlane.xlu0 %2593 }
 0xffa   : > { %v2598_v61 = vsub.f32 %v2583_v56, %v2594_v60 }
 0xffb   : > { %v2602_v62 = vmul.f32 1.442695, %v2599_v59 }
 0xffc   : > { %v2600_v63 = vmul.f32 1.442695, %v2598_v61  ;;  %v3305_v0 = vpop.permute.xlu1 %3304 }
 0xffd   : > { %v3307_v1 = vunpack.i.h.bf16 %v3305_v0  ;;  %v3306_v2 = vunpack.i.l.bf16 %v3305_v0 }
 0xffe   : > { %3350 = vpow2.f32 %v2600_v63 }
 0xfff   : > { %v3225_v4 = vpack.c.bf16 %v3307_v1, %v3306_v2  ;;  %3352 = vpow2.f32 %v2602_v62 }
0x1000   : > { %v2284_v5 = vpop.permute.xlu1 %2283 }
0x1001   : > { %2289 = vst.msk [vmem:[#allocation2 + $0x8] sm:$0xff] %vm2287_vm11, %v2284_v5  ;;  %3226 = vmatprep.subr.bf16.mxu0 %v3225_v4 }
0x1002   : > { %3228 = vmatpush3.bf16.msra.mxu0 %v3225_v4 }
0x1003   : > { %3229 = vmatprep.subr.bf16.mxu0 %v3366_v9 }
0x1004   : > { %v2493_v15 = vpop.permute.xlu1 %2492 }
0x1008   : > { %v3351_v11 = vpop.eup %3350 }
0x1009   : > { %v2604_v6 = vsel %vm1967_vm10, %v3351_v11, 0.0  ;;  %v3353_v8 = vpop.eup %3352 }
0x100a   : > { %2605 = vadd.xlane.f32.xlu0 %v2604_v6  ;;  %v2607_v37 = vsel %vm1967_vm10, %v3353_v8, 0.0 }
0x100e   : > { %2608 = vadd.xlane.f32.xlu0 %v2607_v37 }
0x1024   : > { %2281 = vrot.lane.b32.xlu0 %v3750_v24, %s3381_s0 }
0x1028   : > { %2494 = vrot.lane.b32.xlu0 %v3145_v53, %s3382_s24 }
0x1097   : > { %v2606_v16 = vpop.xlane.xlu0 %2605 }
0x1098   : > { %3354 = vrcp.f32 %v2606_v16 }
0x109b   : > { %v2609_v12 = vpop.xlane.xlu0 %2608 }
0x109c   : > { %3356 = vrcp.f32 %v2609_v12 }
0x109f   : > { %v2282_v13 = vpop.permute.xlu0 %2281 }
0x10a0   : > { %2288 = vst.msk [vmem:[#allocation2] sm:$0xff] %vm2287_vm11, %v2282_v13 }
0x10a1   : > { %2499 = vst.msk [vmem:[#allocation2] sm:$0xff] %vm2498_vm12, %v2493_v15 }
0x10a2   : > { %v3355_v9 = vpop.eup %3354 }
0x10a3   : > { %v2495_v17 = vpop.permute.xlu0 %2494  ;;  %v2611_v20 = vmul.f32 %v3355_v9, %v3351_v11 }
0x10a4   : > { %2500 = vst.msk [vmem:[#allocation2 + $0x8] sm:$0xff] %vm2498_vm12, %v2495_v17 }
0x10a5   : > { %3157 = vmatprep.mubr.msk.f32.mxu0 %vm1967_vm10, %v2611_v20 }
0x10a6   : > { %v3357_v21 = vpop.eup %3356 }
0x10a7   : > { %v2613_v22 = vmul.f32 %v3357_v21, %v3353_v8 }
0x10a9   : > { %3158 = vmatmul.mubr.msk.f32.vlgmr.msra.gmra.mrb[16].mxu0 %vm1967_vm10, %v2613_v22 }
0x10aa   : > { %3164 = vmatprep.mubr.msk.f32.mxu0 %vm3367_vm5, %v3368_v18 }
0x117c   : > { %v3159_v23 = vpop.f32.mrb[16].mxu0 }
0x117d   : > { %2705 = vrot.lane.b32.xlu0 %v3159_v23, %s3383_s25  ;;  %v2692_v24 = vpop.f32.mrb[17].mxu0 }
0x117e   : > { %2703 = vrot.lane.b32.xlu1 %v2692_v24, %s3383_s25 }
0x1182   : > { %2718 = vperm.xlu1 %3308, %v2715_v25  }
0x11ef   : > { %v2706_v27 = vpop.permute.xlu0 %2705 }
0x11f0   : > { %2711 = vst.msk [vmem:[#allocation2 + $0x8] sm:$0xff] %vm2709_vm13, %v2706_v27  ;;  %v2704_v28 = vpop.permute.xlu1 %2703 }
0x11f1   : > { %2710 = vst.msk [vmem:[#allocation2] sm:$0xff] %vm2709_vm13, %v2704_v28 }
0x11f7   : > { %v2713_v18 = vld [vmem:[#allocation2 + $0x8] sm:$0xff] }
0x11f8   : > { %v2712_v29 = vld [vmem:[#allocation2] sm:$0xff] }
0x11f9   : > { %v3230_v30 = vpack.c.bf16 %v2713_v18, %v2712_v29 }
0x11fb   : > { %3232 = vmatpush3.bf16.xpose.msk.msra.mxu0 %vm3231_vm14, %v3230_v30 }
0x1201   : > { %v2719_v32 = vpop.permute.xlu1 %2718 }
0x1202   : > { %3165 = vmatmul.mubr.msk.f32.vlgmr.msra.gmra.mrb[18].mxu0 %vm1501_vm6, %v2714_v31 }
0x12d5   : > { %v2796_v33 = vpop.f32.mrb[18].mxu0 }
0x12d6   : > { %v2797_v34 = vadd.f32 %v2796_v33, %v2719_v32  ;;  %v3166_v35 = vpop.f32.mrb[19].mxu0 }
0x12d8   : > { %v2800_v38 = vand.u32 2147483647, %v2797_v34 }
0x12da   : > { %v2801_v39 = vsub.f32 0.0, %v2800_v38  ;;  %v2803_v40 = vsel %vm2802_vm15, %v2797_v34, %v2800_v38 }
0x12dc   : > { %v2804_v41 = vsel %vm596_vm2, %v2801_v39, %v2803_v40 }
0x12dd   : > { %2806 = vst.msk [vmem:[%s587_s2] sm:$0x7] %vm2805_vm0, %v2804_v41 }
0x12de PF: > { %s28_s27 = sadd.s32 1, %s3364_s27  }
0x12df   : > { %p25_p4 = scmp.ge.s32.totalorder %s28_s27, 4  }
0x12e1   :  { %27 = sbr.rel (!%p25_p4) target bundleno = 4 (0x4), region = 125 }

</bundles_post_ra>
